<compile_context>
chip_gen: v7x
topology: tpu7x:2x2x1
jax: 0.10.0
libtpu: 0.0.40
codegen_flags: <defaults>
</compile_context>

<pallas_src>
import functools

import jax
import jax.numpy as jnp
import numpy as np
from jax.experimental import pallas as pl
from jax.experimental.pallas import tpu as pltpu

_EPS = 1e-5                      # InstanceNorm2d default eps
_INV_SQRT2 = 0.7071067811865476


def _upscale_kernel(x_ref, w_ref, mask_ref, out_ref, *, h, w, cout):
    # x_ref:    (1, Rtot, Cin)    zero-padded input, flattened over (H+2, W+2)
    # w_ref:    (9, Cin, 4*Cout)  merged 3x3 sub-pixel conv weight
    # mask_ref: (rows, 1)         1.0 where the padded-grid row is a valid pixel
    # out_ref:  (1, rows, 4*Cout) rows = H*(W+2); lanes ordered (phase=2a+b, co)
    wp = w + 2
    rows = h * wp

    # Sub-pixel transposed conv: 9 shifted row-slices, one fused matmul each.
    acc = jnp.zeros((rows, 4 * cout), jnp.float32)
    for s in range(9):
        sy, sx = divmod(s, 3)
        start = sy * wp + sx
        xs = x_ref[0, start:start + rows, :]              # (rows, Cin)
        acc = acc + jnp.dot(xs, w_ref[s],
                            preferred_element_type=jnp.float32)

    # InstanceNorm2d (no affine): per-channel stats over 4 phases x H x W valid
    # positions, one pass (sum & sum-of-squares).  Pad columns are masked out.
    mask = mask_ref[...]                                  # (rows, 1)
    masked = acc * mask
    s1 = jnp.sum(masked, axis=0, keepdims=True)           # (1, 4*Cout)
    s2 = jnp.sum(masked * acc, axis=0, keepdims=True)     # (1, 4*Cout)
    # Fold the 4 phase lane-groups back onto the Cout channels.
    s1 = (s1[:, 0:cout] + s1[:, cout:2 * cout]
          + s1[:, 2 * cout:3 * cout] + s1[:, 3 * cout:4 * cout])
    s2 = (s2[:, 0:cout] + s2[:, cout:2 * cout]
          + s2[:, 2 * cout:3 * cout] + s2[:, 3 * cout:4 * cout])
    inv_cnt = 1.0 / (4.0 * h * w)
    mean = s1 * inv_cnt
    var = jnp.maximum(s2 * inv_cnt - mean * mean, 0.0)
    inv = jax.lax.rsqrt(var + _EPS)
    mean4 = jnp.concatenate([mean, mean, mean, mean], axis=1)   # (1, 4*Cout)
    inv4 = jnp.concatenate([inv, inv, inv, inv], axis=1)

    yn = (acc - mean4) * inv4
    # exact (erf-based) GELU, matching torch.nn.GELU default
    g = 0.5 * yn * (1.0 + jax.lax.erf(yn * _INV_SQRT2))
    out_ref[0] = g.astype(out_ref.dtype)


def _make_subpixel_weight(w):
    # w: ConvTranspose2d weight, shape (Cin, Cout, 4, 4)
    # Returns Wbig: (9, Cin, 4*Cout) such that the stride-2 deconv equals a
    # 3x3 conv over the 1-padded input producing the 4 sub-pixel phases as
    # extra channels:  out[(p,q), (2a+b)*Cout+co]
    #   = sum_{sy,sx,ci} x_pad[p+sy, q+sx, ci] * Wbig[3*sy+sx, ci, (2a+b)*Cout+co]
    cin, cout = w.shape[0], w.shape[1]
    blocks = []
    for sy in range(3):
        for sx in range(3):
            cols = []
            for a in range(2):
                for b in range(2):
                    if 0 <= sy - a <= 1 and 0 <= sx - b <= 1:
                        cols.append(w[:, :, 3 + a - 2 * sy, 3 + b - 2 * sx])
                    else:
                        cols.append(jnp.zeros((cin, cout), w.dtype))
            blocks.append(jnp.concatenate(cols, axis=1))   # (Cin, 4*Cout)
    return jnp.stack(blocks)                               # (9, Cin, 4*Cout)


def up_scale_forward(x_nchw, w):
    """Up_scale forward.  x_nchw: (N, Cin, H, W);  w: (Cin, Cin//2, 4, 4)."""
    n, cin, h, wd = x_nchw.shape
    cout = cin // 2
    wp = wd + 2                         # padded width
    rows = h * wp                       # output rows on the padded-width grid
    rtot = ((h + 2) * wp + 2 + 7) // 8 * 8   # input rows (+2 slack, 8-aligned)

    xh = jnp.transpose(x_nchw, (0, 2, 3, 1)).astype(jnp.float32)      # NHWC
    xp = jnp.pad(xh, ((0, 0), (1, 1), (1, 1), (0, 0)))                # (N,H+2,W+2,Cin)
    x_flat = xp.reshape(n, (h + 2) * wp, cin)
    x_flat = jnp.pad(x_flat, ((0, 0), (0, rtot - (h + 2) * wp), (0, 0)))

    w_big = _make_subpixel_weight(w.astype(jnp.float32))              # (9,Cin,4*Cout)
    mask = jnp.asarray(
        (np.arange(rows) % wp < wd).astype(np.float32).reshape(rows, 1))

    kernel = functools.partial(_upscale_kernel, h=h, w=wd, cout=cout)
    out = pl.pallas_call(
        kernel,
        out_shape=jax.ShapeDtypeStruct((n, rows, 4 * cout), jnp.float32),
        grid_spec=pltpu.PrefetchScalarGridSpec(
            num_scalar_prefetch=0,
            grid=(n,),
            in_specs=[
                pl.BlockSpec((1, rtot, cin), lambda i: (i, 0, 0)),
                pl.BlockSpec((9, cin, 4 * cout), lambda i: (0, 0, 0)),
                pl.BlockSpec((rows, 1), lambda i: (0, 0)),
            ],
            out_specs=pl.BlockSpec((1, rows, 4 * cout), lambda i: (i, 0, 0)),
        ),
        compiler_params=pltpu.CompilerParams(
            dimension_semantics=("parallel",)),
    )(x_flat, w_big, mask)

    # out[n, p*(W+2)+q, (2a+b)*Cout+co] = y[n, 2p+a, 2q+b, co]  (q < W valid);
    # single wrapper transpose does the pixel-unshuffle AND the NCHW conversion.
    y = out.reshape(n, h, wp, 2, 2, cout)[:, :, :wd]
    y = jnp.transpose(y, (0, 5, 1, 3, 2, 4)).reshape(n, cout, 2 * h, 2 * wd)
    return y


def _reference(x_nchw, w):
    # pure-JAX reference: transposed conv == dilated conv with flipped kernel
    xh = jnp.transpose(x_nchw, (0, 2, 3, 1)).astype(jnp.float32)
    w_hwio = jnp.transpose(w[:, :, ::-1, ::-1], (2, 3, 0, 1)).astype(jnp.float32)
    y = jax.lax.conv_general_dilated(
        xh, w_hwio, window_strides=(1, 1), padding=((2, 2), (2, 2)),
        lhs_dilation=(2, 2), dimension_numbers=("NHWC", "HWIO", "NHWC"))
    mean = jnp.mean(y, axis=(1, 2), keepdims=True)
    var = jnp.mean((y - mean) ** 2, axis=(1, 2), keepdims=True)
    yn = (y - mean) * jax.lax.rsqrt(var + _EPS)
    g = 0.5 * yn * (1.0 + jax.lax.erf(yn * _INV_SQRT2))
    return jnp.transpose(g, (0, 3, 1, 2))


if __name__ == "__main__":
    key = jax.random.PRNGKey(0)
    k_x, k_w = jax.random.split(key)
    N, Cin, H, W = 2, 4, 16, 16
    x = jax.random.normal(k_x, (N, Cin, H, W), dtype=jnp.float32)
    # ConvTranspose2d weight: (in_channel, out_channel, kH, kW); bias disabled
    # (norm=True forces bias=False in BasicConv).  Deterministic init.
    w = jax.random.normal(k_w, (Cin, Cin // 2, 4, 4), dtype=jnp.float32) * 0.1

    out = jax.block_until_ready(up_scale_forward(x, w))
    ref = jax.block_until_ready(_reference(x, w))
    assert out.shape == (N, Cin // 2, 2 * H, 2 * W), out.shape
    assert np.allclose(np.asarray(out), np.asarray(ref), atol=1e-4, rtol=1e-4)
    print("KERNEL_OK")
</pallas_src>

<mosaic_0001>
module attributes {stable_mosaic.version = 11 : i64} {
  func.func @_upscale_kernel(%arg0: i32, %arg1: memref<1x328x4xf32, #tpu.memory_space<vmem>>, %arg2: memref<9x4x8xf32, #tpu.memory_space<vmem>>, %arg3: memref<288x1xf32, #tpu.memory_space<vmem>>, %arg4: memref<1x288x8xf32, #tpu.memory_space<vmem>>) attributes {dimension_semantics = [#tpu.dimension_semantics<parallel>], iteration_bounds = array<i64: 2>, scalar_prefetch = 0 : i64, scratch_operands = 0 : i64, tpu.core_type = #tpu.core_type<tc>, window_params = [{transform_indices = @transform_0, window_bounds = array<i64: 1, 328, 4>}, {pipeline_mode = #tpu.pipeline_mode<synchronous>, transform_indices = @transform_1, window_bounds = array<i64: 9, 4, 8>}, {pipeline_mode = #tpu.pipeline_mode<synchronous>, transform_indices = @transform_2, window_bounds = array<i64: 288, 1>}, {transform_indices = @transform_3, window_bounds = array<i64: 1, 288, 8>}]} {
    %cst = arith.constant 0.000000e+00 : f32
    %0 = vector.broadcast %cst : f32 to vector<288x8xf32>
    %c0 = arith.constant 0 : index
    %c0_0 = arith.constant 0 : index
    %c0_1 = arith.constant 0 : index
    %1 = vector.load %arg1[%c0, %c0_0, %c0_1] : memref<1x328x4xf32, #tpu.memory_space<vmem>>, vector<1x288x4xf32>
    %2 = vector.shape_cast %1 : vector<1x288x4xf32> to vector<288x4xf32>
    %c0_2 = arith.constant 0 : index
    %c0_3 = arith.constant 0 : index
    %c0_4 = arith.constant 0 : index
    %3 = vector.load %arg2[%c0_2, %c0_3, %c0_4] : memref<9x4x8xf32, #tpu.memory_space<vmem>>, vector<1x4x8xf32>
    %4 = vector.shape_cast %3 : vector<1x4x8xf32> to vector<4x8xf32>
    %cst_5 = arith.constant dense<0.000000e+00> : vector<288x8xf32>
    %5 = tpu.matmul %2, %4, %cst_5 {dimension_numbers = #tpu.dot_dimension_numbers<[1], [0], [0], [1], [0, 0, 1, 1], [], []>} : vector<288x4xf32>, vector<4x8xf32>, vector<288x8xf32> -> vector<288x8xf32>
    %6 = arith.addf %0, %5 : vector<288x8xf32>
    %c0_6 = arith.constant 0 : index
    %c1 = arith.constant 1 : index
    %c0_7 = arith.constant 0 : index
    %7 = vector.load %arg1[%c0_6, %c1, %c0_7] : memref<1x328x4xf32, #tpu.memory_space<vmem>>, vector<1x288x4xf32>
    %8 = vector.shape_cast %7 : vector<1x288x4xf32> to vector<288x4xf32>
    %c1_8 = arith.constant 1 : index
    %c0_9 = arith.constant 0 : index
    %c0_10 = arith.constant 0 : index
    %9 = vector.load %arg2[%c1_8, %c0_9, %c0_10] : memref<9x4x8xf32, #tpu.memory_space<vmem>>, vector<1x4x8xf32>
    %10 = vector.shape_cast %9 : vector<1x4x8xf32> to vector<4x8xf32>
    %cst_11 = arith.constant dense<0.000000e+00> : vector<288x8xf32>
    %11 = tpu.matmul %8, %10, %cst_11 {dimension_numbers = #tpu.dot_dimension_numbers<[1], [0], [0], [1], [0, 0, 1, 1], [], []>} : vector<288x4xf32>, vector<4x8xf32>, vector<288x8xf32> -> vector<288x8xf32>
    %12 = arith.addf %6, %11 : vector<288x8xf32>
    %c0_12 = arith.constant 0 : index
    %c2 = arith.constant 2 : index
    %c0_13 = arith.constant 0 : index
    %13 = vector.load %arg1[%c0_12, %c2, %c0_13] : memref<1x328x4xf32, #tpu.memory_space<vmem>>, vector<1x288x4xf32>
    %14 = vector.shape_cast %13 : vector<1x288x4xf32> to vector<288x4xf32>
    %c2_14 = arith.constant 2 : index
    %c0_15 = arith.constant 0 : index
    %c0_16 = arith.constant 0 : index
    %15 = vector.load %arg2[%c2_14, %c0_15, %c0_16] : memref<9x4x8xf32, #tpu.memory_space<vmem>>, vector<1x4x8xf32>
    %16 = vector.shape_cast %15 : vector<1x4x8xf32> to vector<4x8xf32>
    %cst_17 = arith.constant dense<0.000000e+00> : vector<288x8xf32>
    %17 = tpu.matmul %14, %16, %cst_17 {dimension_numbers = #tpu.dot_dimension_numbers<[1], [0], [0], [1], [0, 0, 1, 1], [], []>} : vector<288x4xf32>, vector<4x8xf32>, vector<288x8xf32> -> vector<288x8xf32>
    %18 = arith.addf %12, %17 : vector<288x8xf32>
    %c0_18 = arith.constant 0 : index
    %c18 = arith.constant 18 : index
    %c0_19 = arith.constant 0 : index
    %19 = vector.load %arg1[%c0_18, %c18, %c0_19] : memref<1x328x4xf32, #tpu.memory_space<vmem>>, vector<1x288x4xf32>
    %20 = vector.shape_cast %19 : vector<1x288x4xf32> to vector<288x4xf32>
    %c3 = arith.constant 3 : index
    %c0_20 = arith.constant 0 : index
    %c0_21 = arith.constant 0 : index
    %21 = vector.load %arg2[%c3, %c0_20, %c0_21] : memref<9x4x8xf32, #tpu.memory_space<vmem>>, vector<1x4x8xf32>
    %22 = vector.shape_cast %21 : vector<1x4x8xf32> to vector<4x8xf32>
    %cst_22 = arith.constant dense<0.000000e+00> : vector<288x8xf32>
    %23 = tpu.matmul %20, %22, %cst_22 {dimension_numbers = #tpu.dot_dimension_numbers<[1], [0], [0], [1], [0, 0, 1, 1], [], []>} : vector<288x4xf32>, vector<4x8xf32>, vector<288x8xf32> -> vector<288x8xf32>
    %24 = arith.addf %18, %23 : vector<288x8xf32>
    %c0_23 = arith.constant 0 : index
    %c19 = arith.constant 19 : index
    %c0_24 = arith.constant 0 : index
    %25 = vector.load %arg1[%c0_23, %c19, %c0_24] : memref<1x328x4xf32, #tpu.memory_space<vmem>>, vector<1x288x4xf32>
    %26 = vector.shape_cast %25 : vector<1x288x4xf32> to vector<288x4xf32>
    %c4 = arith.constant 4 : index
    %c0_25 = arith.constant 0 : index
    %c0_26 = arith.constant 0 : index
    %27 = vector.load %arg2[%c4, %c0_25, %c0_26] : memref<9x4x8xf32, #tpu.memory_space<vmem>>, vector<1x4x8xf32>
    %28 = vector.shape_cast %27 : vector<1x4x8xf32> to vector<4x8xf32>
    %cst_27 = arith.constant dense<0.000000e+00> : vector<288x8xf32>
    %29 = tpu.matmul %26, %28, %cst_27 {dimension_numbers = #tpu.dot_dimension_numbers<[1], [0], [0], [1], [0, 0, 1, 1], [], []>} : vector<288x4xf32>, vector<4x8xf32>, vector<288x8xf32> -> vector<288x8xf32>
    %30 = arith.addf %24, %29 : vector<288x8xf32>
    %c0_28 = arith.constant 0 : index
    %c20 = arith.constant 20 : index
    %c0_29 = arith.constant 0 : index
    %31 = vector.load %arg1[%c0_28, %c20, %c0_29] : memref<1x328x4xf32, #tpu.memory_space<vmem>>, vector<1x288x4xf32>
    %32 = vector.shape_cast %31 : vector<1x288x4xf32> to vector<288x4xf32>
    %c5 = arith.constant 5 : index
    %c0_30 = arith.constant 0 : index
    %c0_31 = arith.constant 0 : index
    %33 = vector.load %arg2[%c5, %c0_30, %c0_31] : memref<9x4x8xf32, #tpu.memory_space<vmem>>, vector<1x4x8xf32>
    %34 = vector.shape_cast %33 : vector<1x4x8xf32> to vector<4x8xf32>
    %cst_32 = arith.constant dense<0.000000e+00> : vector<288x8xf32>
    %35 = tpu.matmul %32, %34, %cst_32 {dimension_numbers = #tpu.dot_dimension_numbers<[1], [0], [0], [1], [0, 0, 1, 1], [], []>} : vector<288x4xf32>, vector<4x8xf32>, vector<288x8xf32> -> vector<288x8xf32>
    %36 = arith.addf %30, %35 : vector<288x8xf32>
    %c0_33 = arith.constant 0 : index
    %c36 = arith.constant 36 : index
    %c0_34 = arith.constant 0 : index
    %37 = vector.load %arg1[%c0_33, %c36, %c0_34] : memref<1x328x4xf32, #tpu.memory_space<vmem>>, vector<1x288x4xf32>
    %38 = vector.shape_cast %37 : vector<1x288x4xf32> to vector<288x4xf32>
    %c6 = arith.constant 6 : index
    %c0_35 = arith.constant 0 : index
    %c0_36 = arith.constant 0 : index
    %39 = vector.load %arg2[%c6, %c0_35, %c0_36] : memref<9x4x8xf32, #tpu.memory_space<vmem>>, vector<1x4x8xf32>
    %40 = vector.shape_cast %39 : vector<1x4x8xf32> to vector<4x8xf32>
    %cst_37 = arith.constant dense<0.000000e+00> : vector<288x8xf32>
    %41 = tpu.matmul %38, %40, %cst_37 {dimension_numbers = #tpu.dot_dimension_numbers<[1], [0], [0], [1], [0, 0, 1, 1], [], []>} : vector<288x4xf32>, vector<4x8xf32>, vector<288x8xf32> -> vector<288x8xf32>
    %42 = arith.addf %36, %41 : vector<288x8xf32>
    %c0_38 = arith.constant 0 : index
    %c37 = arith.constant 37 : index
    %c0_39 = arith.constant 0 : index
    %43 = vector.load %arg1[%c0_38, %c37, %c0_39] : memref<1x328x4xf32, #tpu.memory_space<vmem>>, vector<1x288x4xf32>
    %44 = vector.shape_cast %43 : vector<1x288x4xf32> to vector<288x4xf32>
    %c7 = arith.constant 7 : index
    %c0_40 = arith.constant 0 : index
    %c0_41 = arith.constant 0 : index
    %45 = vector.load %arg2[%c7, %c0_40, %c0_41] : memref<9x4x8xf32, #tpu.memory_space<vmem>>, vector<1x4x8xf32>
    %46 = vector.shape_cast %45 : vector<1x4x8xf32> to vector<4x8xf32>
    %cst_42 = arith.constant dense<0.000000e+00> : vector<288x8xf32>
    %47 = tpu.matmul %44, %46, %cst_42 {dimension_numbers = #tpu.dot_dimension_numbers<[1], [0], [0], [1], [0, 0, 1, 1], [], []>} : vector<288x4xf32>, vector<4x8xf32>, vector<288x8xf32> -> vector<288x8xf32>
    %48 = arith.addf %42, %47 : vector<288x8xf32>
    %c0_43 = arith.constant 0 : index
    %c38 = arith.constant 38 : index
    %c0_44 = arith.constant 0 : index
    %49 = vector.load %arg1[%c0_43, %c38, %c0_44] : memref<1x328x4xf32, #tpu.memory_space<vmem>>, vector<1x288x4xf32>
    %50 = vector.shape_cast %49 : vector<1x288x4xf32> to vector<288x4xf32>
    %c8 = arith.constant 8 : index
    %c0_45 = arith.constant 0 : index
    %c0_46 = arith.constant 0 : index
    %51 = vector.load %arg2[%c8, %c0_45, %c0_46] : memref<9x4x8xf32, #tpu.memory_space<vmem>>, vector<1x4x8xf32>
    %52 = vector.shape_cast %51 : vector<1x4x8xf32> to vector<4x8xf32>
    %cst_47 = arith.constant dense<0.000000e+00> : vector<288x8xf32>
    %53 = tpu.matmul %50, %52, %cst_47 {dimension_numbers = #tpu.dot_dimension_numbers<[1], [0], [0], [1], [0, 0, 1, 1], [], []>} : vector<288x4xf32>, vector<4x8xf32>, vector<288x8xf32> -> vector<288x8xf32>
    %54 = arith.addf %48, %53 : vector<288x8xf32>
    %c0_48 = arith.constant 0 : index
    %c0_49 = arith.constant 0 : index
    %55 = vector.load %arg3[%c0_48, %c0_49] : memref<288x1xf32, #tpu.memory_space<vmem>>, vector<288x1xf32>
    %56 = vector.broadcast %55 : vector<288x1xf32> to vector<288x8xf32>
    %57 = arith.mulf %54, %56 : vector<288x8xf32>
    %cst_50 = arith.constant dense<0.000000e+00> : vector<8xf32>
    %58 = vector.multi_reduction <add>, %57, %cst_50 [0] : vector<288x8xf32> to vector<8xf32>
    %59 = vector.shape_cast %58 : vector<8xf32> to vector<1x8xf32>
    %60 = arith.mulf %57, %54 : vector<288x8xf32>
    %cst_51 = arith.constant dense<0.000000e+00> : vector<8xf32>
    %61 = vector.multi_reduction <add>, %60, %cst_51 [0] : vector<288x8xf32> to vector<8xf32>
    %62 = vector.shape_cast %61 : vector<8xf32> to vector<1x8xf32>
    %63 = vector.extract_strided_slice %59 {offsets = [0, 0], sizes = [1, 2], strides = [1, 1]} : vector<1x8xf32> to vector<1x2xf32>
    %64 = vector.extract_strided_slice %59 {offsets = [0, 2], sizes = [1, 2], strides = [1, 1]} : vector<1x8xf32> to vector<1x2xf32>
    %65 = arith.addf %63, %64 : vector<1x2xf32>
    %66 = vector.extract_strided_slice %59 {offsets = [0, 4], sizes = [1, 2], strides = [1, 1]} : vector<1x8xf32> to vector<1x2xf32>
    %67 = arith.addf %65, %66 : vector<1x2xf32>
    %68 = vector.extract_strided_slice %59 {offsets = [0, 6], sizes = [1, 2], strides = [1, 1]} : vector<1x8xf32> to vector<1x2xf32>
    %69 = arith.addf %67, %68 : vector<1x2xf32>
    %70 = vector.extract_strided_slice %62 {offsets = [0, 0], sizes = [1, 2], strides = [1, 1]} : vector<1x8xf32> to vector<1x2xf32>
    %71 = vector.extract_strided_slice %62 {offsets = [0, 2], sizes = [1, 2], strides = [1, 1]} : vector<1x8xf32> to vector<1x2xf32>
    %72 = arith.addf %70, %71 : vector<1x2xf32>
    %73 = vector.extract_strided_slice %62 {offsets = [0, 4], sizes = [1, 2], strides = [1, 1]} : vector<1x8xf32> to vector<1x2xf32>
    %74 = arith.addf %72, %73 : vector<1x2xf32>
    %75 = vector.extract_strided_slice %62 {offsets = [0, 6], sizes = [1, 2], strides = [1, 1]} : vector<1x8xf32> to vector<1x2xf32>
    %76 = arith.addf %74, %75 : vector<1x2xf32>
    %cst_52 = arith.constant 9.765625E-4 : f32
    %77 = vector.broadcast %cst_52 : f32 to vector<1x2xf32>
    %78 = arith.mulf %69, %77 : vector<1x2xf32>
    %cst_53 = arith.constant 9.765625E-4 : f32
    %79 = vector.broadcast %cst_53 : f32 to vector<1x2xf32>
    %80 = arith.mulf %76, %79 : vector<1x2xf32>
    %81 = arith.mulf %78, %78 : vector<1x2xf32>
    %82 = arith.subf %80, %81 : vector<1x2xf32>
    %cst_54 = arith.constant 0.000000e+00 : f32
    %83 = vector.broadcast %cst_54 : f32 to vector<1x2xf32>
    %84 = arith.maximumf %82, %83 : vector<1x2xf32>
    %cst_55 = arith.constant 9.99999974E-6 : f32
    %85 = vector.broadcast %cst_55 : f32 to vector<1x2xf32>
    %86 = arith.addf %84, %85 : vector<1x2xf32>
    %87 = math.rsqrt %86 : vector<1x2xf32>
    %88 = tpu.concatenate %78, %78, %78, %78 in 1 : vector<1x2xf32>, vector<1x2xf32>, vector<1x2xf32>, vector<1x2xf32> -> vector<1x8xf32>
    %89 = tpu.concatenate %87, %87, %87, %87 in 1 : vector<1x2xf32>, vector<1x2xf32>, vector<1x2xf32>, vector<1x2xf32> -> vector<1x8xf32>
    %90 = vector.broadcast %88 : vector<1x8xf32> to vector<288x8xf32>
    %91 = arith.subf %54, %90 : vector<288x8xf32>
    %92 = vector.broadcast %89 : vector<1x8xf32> to vector<288x8xf32>
    %93 = arith.mulf %91, %92 : vector<288x8xf32>
    %cst_56 = arith.constant 5.000000e-01 : f32
    %94 = vector.broadcast %cst_56 : f32 to vector<288x8xf32>
    %95 = arith.mulf %94, %93 : vector<288x8xf32>
    %cst_57 = arith.constant 0.707106769 : f32
    %96 = vector.broadcast %cst_57 : f32 to vector<288x8xf32>
    %97 = arith.mulf %93, %96 : vector<288x8xf32>
    %98 = math.erf %97 : vector<288x8xf32>
    %cst_58 = arith.constant 1.000000e+00 : f32
    %99 = vector.broadcast %cst_58 : f32 to vector<288x8xf32>
    %100 = arith.addf %99, %98 : vector<288x8xf32>
    %101 = arith.mulf %95, %100 : vector<288x8xf32>
    %c0_59 = arith.constant 0 : index
    %c0_60 = arith.constant 0 : index
    %c0_61 = arith.constant 0 : index
    %102 = vector.load %arg4[%c0_59, %c0_60, %c0_61] : memref<1x288x8xf32, #tpu.memory_space<vmem>>, vector<1x288x8xf32>
    %103 = vector.shape_cast %102 : vector<1x288x8xf32> to vector<288x8xf32>
    %104 = vector.shape_cast %101 : vector<288x8xf32> to vector<1x288x8xf32>
    tpu.vector_store %arg4[%c0_59, %c0_60, %c0_61], %104 {strides = array<i32>} : memref<1x288x8xf32, #tpu.memory_space<vmem>>, vector<1x288x8xf32>,
    return
  }
  func.func @transform_0(%arg0: i32) -> (i32, i32, i32) {
    %c0_i32 = arith.constant 0 : i32
    %c0_i32_0 = arith.constant 0 : i32
    %c0_i32_1 = arith.constant 0 : i32
    return %arg0, %c0_i32, %c0_i32_0 : i32, i32, i32
  }
  func.func @transform_1(%arg0: i32) -> (i32, i32, i32) {
    %c0_i32 = arith.constant 0 : i32
    %c0_i32_0 = arith.constant 0 : i32
    %c0_i32_1 = arith.constant 0 : i32
    %c0_i32_2 = arith.constant 0 : i32
    return %c0_i32, %c0_i32_0, %c0_i32_1 : i32, i32, i32
  }
  func.func @transform_2(%arg0: i32) -> (i32, i32) {
    %c0_i32 = arith.constant 0 : i32
    %c0_i32_0 = arith.constant 0 : i32
    %c0_i32_1 = arith.constant 0 : i32
    return %c0_i32, %c0_i32_0 : i32, i32
  }
  func.func @transform_3(%arg0: i32) -> (i32, i32, i32) {
    %c0_i32 = arith.constant 0 : i32
    %c0_i32_0 = arith.constant 0 : i32
    %c0_i32_1 = arith.constant 0 : i32
    return %arg0, %c0_i32, %c0_i32_0 : i32, i32, i32
  }
}

</mosaic_0001>

<bundles_post_ra>
// kernel: tpu_custom_call.1
= control target key start
LH: loop header
LB: loop body
LE: loop exit
PB: predicated region body
PF: predicated region fallthrough
CT: control target
= control target key end

     0   :  { %s6431_s12 = smov 0   ;;  %s8104_s0 = inlined_call_operand.vmem [shape: f32[2,328,4], index: 0, kind: input, shape index: {}]   ;;  %s8105_s1 = inlined_call_operand.vmem [shape: f32[9,4,8], index: 1, kind: input, shape index: {}]   ;;  %s8106_s2 = inlined_call_operand.vmem [shape: f32[288,1], index: 2, kind: input, shape index: {}]   ;;  %s8107_s3 = inlined_call_operand.vmem [shape: f32[2,288,8], index: 3, kind: output, shape index: {}]  }
   0x1 LB: > { %s4825_s13 = sadd.s32 4294967295, %s6402_s12   ;;  %p4829_p0 = scmp.ge.s32.totalorder %s6402_s12, 1  ;;  %s6402_s12 = sphi %s6431_s12, %s13_s12  }
   0x2   : > { %p137_p1 = scmp.lt.s32.totalorder %s6402_s12, 3 }
   0x4   : > { %p138_p2 = pnand %p4829_p0, %p137_p1 }
   0x5   : > { %v4832_v0 = vld [vmem:[%s8105_s1 + $0x4] sm:$0xf] (!%p138_p2)  ;;  %vm355_vm0 = vcmask (!%p138_p2), 1043456   ;;  %v6445_v1 = vld [vmem:[%s8105_s1 + $0x10] sm:$0xf] (!%p138_p2)  ;;  %p161_p3 = scmp.lt.s32.totalorder (!%p138_p2), %s4825_s13, 1 }
   0x6   : > { %141 = sbr.rel (%p138_p2) target bundleno = 902 (0x386), region = 32  ;;  %5508 = vmatprep.subr.msk.mxu1 (!%p138_p2), %vm355_vm0, %v4832_v0  ;;  %5732 = vmatprep.subr.msk.mxu0 (!%p138_p2), %vm355_vm0, %v6445_v1  ;;  %v207_v2 = vld [vmem:[%s8105_s1] sm:$0xf] (!%p138_p2)  ;;  %v5021_v3 = vld [vmem:[%s8105_s1 + $0x14] sm:$0xf] (!%p138_p2)  ;;  %vm246_vm1 = vcmask (!%p138_p2), 31744  }
   0x7   : > { %5509 = vmatpush3.msk.msra.mxu1 (!%p138_p2), %vm355_vm0, %v4832_v0  ;;  %5733 = vmatpush3.msk.msra.mxu0 (!%p138_p2), %vm355_vm0, %v6445_v1  ;;  %v6482_v10 = vld [vmem:[%s8105_s1 + $0x18] sm:$0xf] (!%p138_p2)  ;;  %v6487_v11 = vld [vmem:[%s8105_s1 + $0x8] sm:$0xf] (!%p138_p2)  ;;  %v6570_v48 = vld [vmem:[%s8105_s1 + $0x1c] sm:$0xf] (!%p138_p2) }
   0x8   : > { %5564 = vmatprep.subr.msk.mxu1 (!%p138_p2), %vm355_vm0, %v207_v2  ;;  %5788 = vmatprep.subr.msk.mxu0 (!%p138_p2), %vm355_vm0, %v5021_v3  ;;  %vm4222_vm2 = vcmask (!%p138_p2), 64512   ;;  %s6406_s11 = smov (!%p138_p2), 126   ;;  %s6407_s14 = smov (!%p138_p2), 122   ;;  %vm4456_vm3 = vcmask (!%p138_p2), 15360   ;;  %vm4459_vm4 = vcmask (!%p138_p2), 48128  }
   0x9   : > { %s6408_s15 = smov (!%p138_p2), 4   ;;  %s6409_s16 = smov (!%p138_p2), 2  }
   0xa   : > { %s6410_s17 = smov (!%p138_p2), 6  }
   0xd   : > { %s8109_s13 = smov (!%p161_p3, %s4825_s13), 1 }
   0xe   : > { %s6302_s22 = smul.u32 328, %s8109_s13 }
   0xf   : > { %s6303_s18 = smul.u32 288, %s8109_s13 }
  0x10   : > { %s6467_s25 = scalar_lea.vmem %s8104_s0, %s6302_s22 }
  0x11   : > { %v208_v4 = vld [vmem:[%s6467_s25 + $0x1] sm:$0xff]  ;;  %v1820_v5 = vld [vmem:[%s6467_s25 + $0x13] sm:$0xff]  ;;  %v209_v6 = vld [vmem:[%s6467_s25 + $0x9] sm:$0xff]  ;;  %s7971_s20 = scalar_lea.vmem %s8107_s3, %s6303_s18 }
  0x12   : > { %5510 = vmatprep.mubr.msk.f32.mxu1 %vm246_vm1, %v208_v4  ;;  %5734 = vmatprep.mubr.msk.f32.mxu0 %vm246_vm1, %v1820_v5  ;;  %v1821_v7 = vld [vmem:[%s6467_s25 + $0x1b] sm:$0xff]  ;;  %v210_v8 = vld [vmem:[%s6467_s25 + $0x11] sm:$0xff]  ;;  %v1822_v9 = vld [vmem:[%s6467_s25 + $0x23] sm:$0xff] }
  0x13   : > { %5511 = vmatmul.mubr.msk.f32.vlgmr.msra.gmra.mrb[0].mxu1 %vm246_vm1, %v209_v6  ;;  %5735 = vmatmul.mubr.msk.f32.vlgmr.msra.gmra.mrb[0].mxu0 %vm246_vm1, %v1821_v7  ;;  %v211_v12 = vld [vmem:[%s6467_s25 + $0x19] sm:$0xff]  ;;  %v1823_v13 = vld [vmem:[%s6467_s25 + $0x2b] sm:$0xff]  ;;  %v212_v14 = vld [vmem:[%s6467_s25 + $0x21] sm:$0xff] }
  0x14   : > { %5565 = vmatpush3.msk.msra.mxu1 %vm355_vm0, %v207_v2  ;;  %5789 = vmatpush3.msk.msra.mxu0 %vm355_vm0, %v5021_v3  ;;  %v1824_v15 = vld [vmem:[%s6467_s25 + $0x33] sm:$0xff]  ;;  %v213_v16 = vld [vmem:[%s6467_s25 + $0x29] sm:$0xff]  ;;  %v1825_v17 = vld [vmem:[%s6467_s25 + $0x3b] sm:$0xff] }
  0x15   : > { %5513 = vmatprep.mubr.msk.f32.mxu1 %vm246_vm1, %v210_v8  ;;  %5737 = vmatprep.mubr.msk.f32.mxu0 %vm246_vm1, %v1822_v9  ;;  %v214_v18 = vld [vmem:[%s6467_s25 + $0x31] sm:$0xff]  ;;  %v1826_v19 = vld [vmem:[%s6467_s25 + $0x43] sm:$0xff]  ;;  %v215_v20 = vld [vmem:[%s6467_s25 + $0x39] sm:$0xff] }
  0x16   : > { %5844 = vmatprep.subr.msk.mxu0 %vm355_vm0, %v6482_v10  ;;  %5620 = vmatprep.subr.msk.mxu1 %vm355_vm0, %v6487_v11  ;;  %v1827_v21 = vld [vmem:[%s6467_s25 + $0x4b] sm:$0xff]  ;;  %v216_v22 = vld [vmem:[%s6467_s25 + $0x41] sm:$0xff]  ;;  %v1828_v23 = vld [vmem:[%s6467_s25 + $0x53] sm:$0xff] }
  0x17   : > { %5514 = vmatmul.mubr.msk.f32.gmra.mrb[2].mxu1 %vm246_vm1, %v211_v12  ;;  %5738 = vmatmul.mubr.msk.f32.gmra.mrb[2].mxu0 %vm246_vm1, %v1823_v13  ;;  %v217_v24 = vld [vmem:[%s6467_s25 + $0x49] sm:$0xff]  ;;  %v1829_v25 = vld [vmem:[%s6467_s25 + $0x5b] sm:$0xff]  ;;  %v218_v26 = vld [vmem:[%s6467_s25 + $0x51] sm:$0xff] }
  0x18   : > { %5516 = vmatprep.mubr.msk.f32.mxu1 %vm246_vm1, %v212_v14  ;;  %5740 = vmatprep.mubr.msk.f32.mxu0 %vm246_vm1, %v1824_v15  ;;  %v1830_v27 = vld [vmem:[%s6467_s25 + $0x63] sm:$0xff]  ;;  %v219_v28 = vld [vmem:[%s6467_s25 + $0x59] sm:$0xff]  ;;  %v1831_v29 = vld [vmem:[%s6467_s25 + $0x6b] sm:$0xff] }
  0x19   : > { %v220_v30 = vld [vmem:[%s6467_s25 + $0x61] sm:$0xff]  ;;  %v1832_v31 = vld [vmem:[%s6467_s25 + $0x73] sm:$0xff]  ;;  %v221_v32 = vld [vmem:[%s6467_s25 + $0x69] sm:$0xff] }
  0x1a   : > { %v1833_v33 = vld [vmem:[%s6467_s25 + $0x7b] sm:$0xff]  ;;  %v222_v34 = vld [vmem:[%s6467_s25 + $0x71] sm:$0xff]  ;;  %v1834_v35 = vld [vmem:[%s6467_s25 + $0x83] sm:$0xff] }
  0x1b   : > { %5517 = vmatmul.mubr.msk.f32.gmra.mrb[4].mxu1 %vm246_vm1, %v213_v16  ;;  %5741 = vmatmul.mubr.msk.f32.gmra.mrb[4].mxu0 %vm246_vm1, %v1825_v17  ;;  %v223_v36 = vld [vmem:[%s6467_s25 + $0x79] sm:$0xff]  ;;  %v1835_v37 = vld [vmem:[%s6467_s25 + $0x8b] sm:$0xff]  ;;  %v224_v38 = vld [vmem:[%s6467_s25 + $0x81] sm:$0xff] }
  0x1c   : > { %5519 = vmatprep.mubr.msk.f32.mxu1 %vm246_vm1, %v214_v18  ;;  %5743 = vmatprep.mubr.msk.f32.mxu0 %vm246_vm1, %v1826_v19  ;;  %v1836_v39 = vld [vmem:[%s6467_s25 + $0x93] sm:$0xff]  ;;  %v225_v40 = vld [vmem:[%s6467_s25 + $0x89] sm:$0xff]  ;;  %v1837_v41 = vld [vmem:[%s6467_s25 + $0x9b] sm:$0xff] }
  0x1d   : > { %v226_v42 = vld [vmem:[%s6467_s25 + $0x91] sm:$0xff]  ;;  %v227_v44 = vld [vmem:[%s6467_s25 + $0x99] sm:$0xff]  ;;  %v228_v46 = vld [vmem:[%s6467_s25 + $0xa1] sm:$0xff] }
  0x1e   : > { %v2250_v43 = vld [vmem:[%s6467_s25 + $0x14] sm:$0xff]  ;;  %v2251_v45 = vld [vmem:[%s6467_s25 + $0x1c] sm:$0xff]  ;;  %v6565_v47 = vld [vmem:[%s6467_s25 + $0x24] sm:$0xff] }
  0x1f   : > { %5520 = vmatmul.mubr.msk.f32.gmra.mrb[6].mxu1 %vm246_vm1, %v215_v20  ;;  %5744 = vmatmul.mubr.msk.f32.gmra.mrb[6].mxu0 %vm246_vm1, %v1827_v21  ;;  %v229_v49 = vld [vmem:[%s6467_s25 + $0xa9] sm:$0xff]  ;;  %v230_v51 = vld [vmem:[%s6467_s25 + $0xb1] sm:$0xff]  ;;  %v231_v53 = vld [vmem:[%s6467_s25 + $0xb9] sm:$0xff] }
  0x20   : > { %5522 = vmatprep.mubr.msk.f32.mxu1 %vm246_vm1, %v216_v22  ;;  %5746 = vmatprep.mubr.msk.f32.mxu0 %vm246_vm1, %v1828_v23  ;;  %v6579_v50 = vld [vmem:[%s6467_s25 + $0x2c] sm:$0xff]  ;;  %v6585_v52 = vld [vmem:[%s6467_s25 + $0x34] sm:$0xff]  ;;  %v6597_v54 = vld [vmem:[%s6467_s25 + $0x3c] sm:$0xff] }
  0x21   : > { %v232_v55 = vld [vmem:[%s6467_s25 + $0xc1] sm:$0xff]  ;;  %v233_v57 = vld [vmem:[%s6467_s25 + $0xc9] sm:$0xff]  ;;  %v234_v59 = vld [vmem:[%s6467_s25 + $0xd1] sm:$0xff] }
  0x22   : > { %v6601_v56 = vld [vmem:[%s6467_s25 + $0x44] sm:$0xff]  ;;  %v6611_v58 = vld [vmem:[%s6467_s25 + $0x4c] sm:$0xff]  ;;  %v6615_v60 = vld [vmem:[%s6467_s25 + $0x54] sm:$0xff] }
  0x23   : > { %5523 = vmatmul.mubr.msk.f32.gmra.mrb[8].mxu1 %vm246_vm1, %v217_v24  ;;  %5747 = vmatmul.mubr.msk.f32.gmra.mrb[8].mxu0 %vm246_vm1, %v1829_v25  ;;  %v235_v61 = vld [vmem:[%s6467_s25 + $0xd9] sm:$0xff]  ;;  %v236_v63 = vld [vmem:[%s6467_s25 + $0xe1] sm:$0xff]  ;;  %v237_v2 = vld [vmem:[%s6467_s25 + $0xe9] sm:$0xff] }
  0x24   : > { %5525 = vmatprep.mubr.msk.f32.mxu1 %vm246_vm1, %v218_v26  ;;  %5749 = vmatprep.mubr.msk.f32.mxu0 %vm246_vm1, %v1830_v27  ;;  %v6625_v62 = vld [vmem:[%s6467_s25 + $0x5c] sm:$0xff]  ;;  %v6629_v0 = vld [vmem:[%s6467_s25 + $0x64] sm:$0xff]  ;;  %v6639_v3 = vld [vmem:[%s6467_s25 + $0x6c] sm:$0xff] }
  0x25   : > { %v238_v4 = vld [vmem:[%s6467_s25 + $0xf1] sm:$0xff]  ;;  %v239_v6 = vld [vmem:[%s6467_s25 + $0xf9] sm:$0xff]  ;;  %v240_v8 = vld [vmem:[%s6467_s25 + $0x101] sm:$0xff] }
  0x26   : > { %v6643_v5 = vld [vmem:[%s6467_s25 + $0x74] sm:$0xff]  ;;  %v6653_v7 = vld [vmem:[%s6467_s25 + $0x7c] sm:$0xff]  ;;  %v6657_v9 = vld [vmem:[%s6467_s25 + $0x84] sm:$0xff] }
  0x27   : > { %5526 = vmatmul.mubr.msk.f32.gmra.mrb[10].mxu1 %vm246_vm1, %v219_v28  ;;  %5750 = vmatmul.mubr.msk.f32.gmra.mrb[10].mxu0 %vm246_vm1, %v1831_v29  ;;  %v6667_v12 = vld [vmem:[%s6467_s25 + $0x8c] sm:$0xff]  ;;  %v6671_v14 = vld [vmem:[%s6467_s25 + $0x94] sm:$0xff]  ;;  %v6681_v16 = vld [vmem:[%s6467_s25 + $0x9c] sm:$0xff] }
  0x28   : > { %5528 = vmatprep.mubr.msk.f32.mxu1 %vm246_vm1, %v220_v30  ;;  %5752 = vmatprep.mubr.msk.f32.mxu0 %vm246_vm1, %v1832_v31  ;;  %v242_v13 = vld [vmem:[%s6467_s25 + $0x111] sm:$0xff]  ;;  %v243_v15 = vld [vmem:[%s6467_s25 + $0x119] sm:$0xff]  ;;  %v6685_v18 = vld [vmem:[%s6467_s25 + $0xa4] sm:$0xff] }
  0x29   : > { %v171_v17 = vld [vmem:[%s6467_s25] sm:$0xff]  ;;  %v172_v19 = vld [vmem:[%s6467_s25 + $0x8] sm:$0xff]  ;;  %v173_v21 = vld [vmem:[%s6467_s25 + $0x10] sm:$0xff] }
  0x2a   : > { %v6695_v20 = vld [vmem:[%s6467_s25 + $0xac] sm:$0xff]  ;;  %v6699_v22 = vld [vmem:[%s6467_s25 + $0xb4] sm:$0xff]  ;;  %v6714_v25 = vld [vmem:[%s6467_s25 + $0xbc] sm:$0xff] }
  0x2b   : > { %5529 = vmatmul.mubr.msk.f32.gmra.mrb[12].mxu1 %vm246_vm1, %v221_v32  ;;  %5753 = vmatmul.mubr.msk.f32.gmra.mrb[12].mxu0 %vm246_vm1, %v1833_v33  ;;  %v6704_v23 = vld [vmem:[%s8105_s1 + $0xc] sm:$0xf]  ;;  %v174_v24 = vld [vmem:[%s6467_s25 + $0x18] sm:$0xff]  ;;  %v175_v26 = vld [vmem:[%s6467_s25 + $0x20] sm:$0xff] }
  0x2c   : > { %5531 = vmatprep.mubr.msk.f32.mxu1 %vm246_vm1, %v222_v34  ;;  %5755 = vmatprep.mubr.msk.f32.mxu0 %vm246_vm1, %v1834_v35  ;;  %v6720_v27 = vld [vmem:[%s6467_s25 + $0xc4] sm:$0xff]  ;;  %v6732_v28 = vld [vmem:[%s6467_s25 + $0xcc] sm:$0xff]  ;;  %v6736_v30 = vld [vmem:[%s6467_s25 + $0xd4] sm:$0xff] }
  0x2d   : > { %v177_v29 = vld [vmem:[%s6467_s25 + $0x30] sm:$0xff]  ;;  %v178_v31 = vld [vmem:[%s6467_s25 + $0x38] sm:$0xff]  ;;  %v179_v33 = vld [vmem:[%s6467_s25 + $0x40] sm:$0xff] }
  0x2e   : > { %v6746_v32 = vld [vmem:[%s6467_s25 + $0xdc] sm:$0xff]  ;;  %v6750_v34 = vld [vmem:[%s6467_s25 + $0xe4] sm:$0xff] }
  0x2f   : > { %5532 = vmatmul.mubr.msk.f32.gmra.mrb[14].mxu1 %vm246_vm1, %v223_v36  ;;  %5756 = vmatmul.mubr.msk.f32.gmra.mrb[14].mxu0 %vm246_vm1, %v1835_v37  ;;  %v180_v35 = vld [vmem:[%s6467_s25 + $0x48] sm:$0xff]  ;;  %v181_v37 = vld [vmem:[%s6467_s25 + $0x50] sm:$0xff] }
  0x30   : > { %5534 = vmatprep.mubr.msk.f32.mxu1 %vm246_vm1, %v224_v38  ;;  %5758 = vmatprep.mubr.msk.f32.mxu0 %vm246_vm1, %v1836_v39  ;;  %v6760_v36 = vld [vmem:[%s6467_s25 + $0xec] sm:$0xff]  ;;  %v6764_v38 = vld [vmem:[%s6467_s25 + $0xf4] sm:$0xff] }
  0x31   : > { %v182_v39 = vld [vmem:[%s6467_s25 + $0x58] sm:$0xff] }
  0x33   : > { %5535 = vmatmul.mubr.msk.f32.gmra.mrb[16].mxu1 %vm246_vm1, %v225_v40  ;;  %5759 = vmatmul.mubr.msk.f32.gmra.mrb[16].mxu0 %vm246_vm1, %v1837_v41  ;;  %v6774_v40 = vld [vmem:[%s6467_s25 + $0xfc] sm:$0xff] }
  0x34   : > { %5537 = vmatprep.mubr.msk.f32.mxu1 %vm246_vm1, %v226_v42  ;;  %5790 = vmatprep.mubr.msk.f32.mxu0 %vm246_vm1, %v2250_v43  ;;  %v183_v41 = vld [vmem:[%s6467_s25 + $0x60] sm:$0xff]  ;;  %v184_v43 = vld [vmem:[%s6467_s25 + $0x68] sm:$0xff] }
  0x35   : > { %v6778_v42 = vld [vmem:[%s6467_s25 + $0x104] sm:$0xff] }
  0x37   : > { %5538 = vmatmul.mubr.msk.f32.gmra.mrb[18].mxu1 %vm246_vm1, %v227_v44  ;;  %5791 = vmatmul.mubr.msk.f32.vlgmr.msra.gmra.mrb[0].mxu0 %vm246_vm1, %v2251_v45  ;;  %v6788_v44 = vld [vmem:[%s6467_s25 + $0x10c] sm:$0xff] }
  0x38   : > { %5845 = vmatpush3.msk.msra.mxu0 %vm355_vm0, %v6482_v10  ;;  %5540 = vmatprep.mubr.msk.f32.mxu1 %vm246_vm1, %v228_v46  ;;  %v241_v10 = vld [vmem:[%s6467_s25 + $0x109] sm:$0xff]  ;;  %v6792_v46 = vld [vmem:[%s6467_s25 + $0x114] sm:$0xff] }
  0x39   : > { %5793 = vmatprep.mubr.msk.f32.mxu0 %vm246_vm1, %v6565_v47  ;;  %5900 = vmatprep.subr.msk.mxu0 %vm355_vm0, %v6570_v48  ;;  %v185_v45 = vld [vmem:[%s6467_s25 + $0x70] sm:$0xff] }
  0x3b   : > { %5541 = vmatmul.mubr.msk.f32.gmra.mrb[20].mxu1 %vm246_vm1, %v229_v49  ;;  %5794 = vmatmul.mubr.msk.f32.gmra.mrb[2].mxu0 %vm246_vm1, %v6579_v50  ;;  %v186_v49 = vld [vmem:[%s6467_s25 + $0x78] sm:$0xff] }
  0x3c   : > { %5543 = vmatprep.mubr.msk.f32.mxu1 %vm246_vm1, %v230_v51  ;;  %5796 = vmatprep.mubr.msk.f32.mxu0 %vm246_vm1, %v6585_v52  ;;  %v6802_v51 = vld [vmem:[%s6467_s25 + $0x11c] sm:$0xff] }
  0x3f   : > { %5544 = vmatmul.mubr.msk.f32.gmra.mrb[22].mxu1 %vm246_vm1, %v231_v53  ;;  %5797 = vmatmul.mubr.msk.f32.gmra.mrb[4].mxu0 %vm246_vm1, %v6597_v54  ;;  %v187_v53 = vld [vmem:[%s6467_s25 + $0x80] sm:$0xff] }
  0x40   : > { %5546 = vmatprep.mubr.msk.f32.mxu1 %vm246_vm1, %v232_v55  ;;  %5799 = vmatprep.mubr.msk.f32.mxu0 %vm246_vm1, %v6601_v56  ;;  %v6806_v55 = vld [vmem:[%s6467_s25 + $0x124] sm:$0xff] }
  0x43   : > { %5547 = vmatmul.mubr.msk.f32.gmra.mrb[24].mxu1 %vm246_vm1, %v233_v57  ;;  %5800 = vmatmul.mubr.msk.f32.gmra.mrb[6].mxu0 %vm246_vm1, %v6611_v58  ;;  %v188_v57 = vld [vmem:[%s6467_s25 + $0x88] sm:$0xff] }
  0x44   : > { %5549 = vmatprep.mubr.msk.f32.mxu1 %vm246_vm1, %v234_v59  ;;  %5802 = vmatprep.mubr.msk.f32.mxu0 %vm246_vm1, %v6615_v60  ;;  %v6816_v59 = vld [vmem:[%s6467_s25 + $0x12c] sm:$0xff] }
  0x47   : > { %5550 = vmatmul.mubr.msk.f32.gmra.mrb[26].mxu1 %vm246_vm1, %v235_v61  ;;  %5803 = vmatmul.mubr.msk.f32.gmra.mrb[8].mxu0 %vm246_vm1, %v6625_v62  ;;  %v189_v61 = vld [vmem:[%s6467_s25 + $0x90] sm:$0xff] }
  0x48   : > { %5552 = vmatprep.mubr.msk.f32.mxu1 %vm246_vm1, %v236_v63  ;;  %5805 = vmatprep.mubr.msk.f32.mxu0 %vm246_vm1, %v6629_v0  ;;  %v190_v63 = vld [vmem:[%s6467_s25 + $0x98] sm:$0xff] }
  0x4b   : > { %5553 = vmatmul.mubr.msk.f32.gmra.mrb[28].mxu1 %vm246_vm1, %v237_v2  ;;  %5806 = vmatmul.mubr.msk.f32.gmra.mrb[10].mxu0 %vm246_vm1, %v6639_v3  ;;  %v191_v2 = vld [vmem:[%s6467_s25 + $0xa0] sm:$0xff] }
  0x4c   : > { %5555 = vmatprep.mubr.msk.f32.mxu1 %vm246_vm1, %v238_v4  ;;  %5808 = vmatprep.mubr.msk.f32.mxu0 %vm246_vm1, %v6643_v5  ;;  %v6830_v4 = vld [vmem:[%s8105_s1 + $0x20] sm:$0xf] }
  0x4f   : > { %5556 = vmatmul.mubr.msk.f32.gmra.mrb[30].mxu1 %vm246_vm1, %v239_v6  ;;  %5809 = vmatmul.mubr.msk.f32.gmra.mrb[12].mxu0 %vm246_vm1, %v6653_v7  ;;  %v193_v6 = vld [vmem:[%s6467_s25 + $0xb0] sm:$0xff] }
  0x50   : > { %5558 = vmatprep.mubr.msk.f32.mxu1 %vm246_vm1, %v240_v8  ;;  %5811 = vmatprep.mubr.msk.f32.mxu0 %vm246_vm1, %v6657_v9  ;;  %v206_v8 = vld [vmem:[%s6467_s25 + $0x118] sm:$0xff] }
  0x53   : > { %5559 = vmatmul.mubr.msk.f32.gmra.mrb[32].mxu1 %vm246_vm1, %v241_v10  ;;  %5812 = vmatmul.mubr.msk.f32.gmra.mrb[14].mxu0 %vm246_vm1, %v6667_v12  ;;  %v6404_v10 = vmov 0  }
  0x54   : > { %5561 = vmatprep.mubr.msk.f32.mxu1 %vm246_vm1, %v242_v13  ;;  %5814 = vmatprep.mubr.msk.f32.mxu0 %vm246_vm1, %v6671_v14  ;;  %v961_v13 = vld [vmem:[%s6467_s25 + $0xa] sm:$0xff] }
  0x55   : > { %6319 = vset.pattern.permute.xlu0 %v6404_v10  ;;  %6320 = vset.pattern.permute.xlu1 %v6404_v10  ;;  %v3996_v10 = vld [vmem:[%s8106_s2 + $0xd0] sm:$0xff] }
  0x57   : > { %5562 = vmatmul.mubr.msk.f32.gmra.mrb[34].mxu1 %vm246_vm1, %v243_v15  ;;  %5815 = vmatmul.mubr.msk.f32.gmra.mrb[16].mxu0 %vm246_vm1, %v6681_v16  ;;  %v3972_v15 = vld [vmem:[%s8106_s2 + $0x10] sm:$0xff] }
  0x58   : > { %5566 = vmatprep.mubr.msk.f32.mxu1 %vm246_vm1, %v171_v17  ;;  %5817 = vmatprep.mubr.msk.f32.mxu0 %vm246_vm1, %v6685_v18  ;;  %v6927_v17 = vld [vmem:[%s6467_s25 + $0x1a] sm:$0xff] }
  0x59   : > { %4018 = vperm.xlu1 %6320, %v3972_v15   ;;  %v7177_v15 = vld [vmem:[%s6467_s25 + $0xe2] sm:$0xff] }
  0x5b   : > { %5567 = vmatmul.mubr.msk.f32.vlgmr.msra.gmra.mrb[0].mxu1 %vm246_vm1, %v172_v19  ;;  %5818 = vmatmul.mubr.msk.f32.gmra.mrb[18].mxu0 %vm246_vm1, %v6695_v20  ;;  %v3973_v19 = vld [vmem:[%s8106_s2 + $0x18] sm:$0xff] }
  0x5c   : > { %5621 = vmatpush3.msk.msra.mxu1 %vm355_vm0, %v6487_v11  ;;  %5569 = vmatprep.mubr.msk.f32.mxu1 %vm246_vm1, %v173_v21  ;;  %v176_v11 = vld [vmem:[%s6467_s25 + $0x28] sm:$0xff]  ;;  %v6954_v21 = vld [vmem:[%s6467_s25 + $0x32] sm:$0xff] }
  0x5d   : > { %5820 = vmatprep.mubr.msk.f32.mxu0 %vm246_vm1, %v6699_v22  ;;  %5676 = vmatprep.subr.msk.mxu1 %vm355_vm0, %v6704_v23 }
  0x5e   : > { %4023 = vperm.xlu1 %6320, %v3973_v19   ;;  %v3997_v19 = vld [vmem:[%s8106_s2 + $0xd8] sm:$0xff] }
  0x5f   : > { %5570 = vmatmul.mubr.msk.f32.gmra.mrb[2].mxu1 %vm246_vm1, %v174_v24  ;;  %5821 = vmatmul.mubr.msk.f32.gmra.mrb[20].mxu0 %vm246_vm1, %v6714_v25  ;;  %v6971_v24 = vld [vmem:[%s6467_s25 + $0x3a] sm:$0xff] }
  0x60   : > { %5572 = vmatprep.mubr.msk.f32.mxu1 %vm246_vm1, %v175_v26  ;;  %5823 = vmatprep.mubr.msk.f32.mxu0 %vm246_vm1, %v6720_v27  ;;  %v3977_v26 = vld [vmem:[%s8106_s2 + $0x38] sm:$0xff] }
  0x63   : > { %5573 = vmatmul.mubr.msk.f32.gmra.mrb[4].mxu1 %vm246_vm1, %v176_v11  ;;  %5824 = vmatmul.mubr.msk.f32.gmra.mrb[22].mxu0 %vm246_vm1, %v6732_v28  ;;  %v6991_v11 = vld [vmem:[%s6467_s25 + $0x4a] sm:$0xff] }
  0x64   : > { %5575 = vmatprep.mubr.msk.f32.mxu1 %vm246_vm1, %v177_v29  ;;  %5826 = vmatprep.mubr.msk.f32.mxu0 %vm246_vm1, %v6736_v30  ;;  %v3979_v29 = vld [vmem:[%s8106_s2 + $0x48] sm:$0xff] }
  0x67   : > { %5576 = vmatmul.mubr.msk.f32.gmra.mrb[6].mxu1 %vm246_vm1, %v178_v31  ;;  %5827 = vmatmul.mubr.msk.f32.gmra.mrb[24].mxu0 %vm246_vm1, %v6746_v32  ;;  %v7011_v31 = vld [vmem:[%s6467_s25 + $0x5a] sm:$0xff] }
  0x68   : > { %5578 = vmatprep.mubr.msk.f32.mxu1 %vm246_vm1, %v179_v33  ;;  %5829 = vmatprep.mubr.msk.f32.mxu0 %vm246_vm1, %v6750_v34  ;;  %v3981_v33 = vld [vmem:[%s8106_s2 + $0x58] sm:$0xff] }
  0x6b   : > { %5579 = vmatmul.mubr.msk.f32.gmra.mrb[8].mxu1 %vm246_vm1, %v180_v35  ;;  %5830 = vmatmul.mubr.msk.f32.gmra.mrb[26].mxu0 %vm246_vm1, %v6760_v36  ;;  %v7031_v35 = vld [vmem:[%s6467_s25 + $0x6a] sm:$0xff] }
  0x6c   : > { %5581 = vmatprep.mubr.msk.f32.mxu1 %vm246_vm1, %v181_v37  ;;  %5832 = vmatprep.mubr.msk.f32.mxu0 %vm246_vm1, %v6764_v38  ;;  %v3983_v37 = vld [vmem:[%s8106_s2 + $0x68] sm:$0xff] }
  0x6f   : > { %5582 = vmatmul.mubr.msk.f32.gmra.mrb[10].mxu1 %vm246_vm1, %v182_v39  ;;  %5833 = vmatmul.mubr.msk.f32.gmra.mrb[28].mxu0 %vm246_vm1, %v6774_v40  ;;  %v7051_v39 = vld [vmem:[%s6467_s25 + $0x7a] sm:$0xff] }
  0x70   : > { %5584 = vmatprep.mubr.msk.f32.mxu1 %vm246_vm1, %v183_v41  ;;  %5835 = vmatprep.mubr.msk.f32.mxu0 %vm246_vm1, %v6778_v42  ;;  %v2714_v41 = vld [vmem:[%s6467_s25 + $0x134] sm:$0xff] }
  0x73   : > { %5585 = vmatmul.mubr.msk.f32.gmra.mrb[12].mxu1 %vm246_vm1, %v184_v43  ;;  %5836 = vmatmul.mubr.msk.f32.gmra.mrb[30].mxu0 %vm246_vm1, %v6788_v44  ;;  %v3986_v43 = vld [vmem:[%s8106_s2 + $0x80] sm:$0xff] }
  0x74   : > { %5587 = vmatprep.mubr.msk.f32.mxu1 %vm246_vm1, %v185_v45  ;;  %5838 = vmatprep.mubr.msk.f32.mxu0 %vm246_vm1, %v6792_v46  ;;  %v2715_v45 = vld [vmem:[%s6467_s25 + $0x13c] sm:$0xff] }
  0x77   : > { %5588 = vmatmul.mubr.msk.f32.gmra.mrb[14].mxu1 %vm246_vm1, %v186_v49  ;;  %5839 = vmatmul.mubr.msk.f32.gmra.mrb[32].mxu0 %vm246_vm1, %v6802_v51  ;;  %v3110_v49 = vld [vmem:[%s6467_s25 + $0x25] sm:$0xff] }
  0x78   : > { %5590 = vmatprep.mubr.msk.f32.mxu1 %vm246_vm1, %v187_v53  ;;  %5841 = vmatprep.mubr.msk.f32.mxu0 %vm246_vm1, %v6806_v55  ;;  %v3988_v53 = vld [vmem:[%s8106_s2 + $0x90] sm:$0xff] }
  0x7b   : > { %5591 = vmatmul.mubr.msk.f32.gmra.mrb[16].mxu1 %vm246_vm1, %v188_v57  ;;  %5842 = vmatmul.mubr.msk.f32.gmra.mrb[34].mxu0 %vm246_vm1, %v6816_v59  ;;  %v3111_v57 = vld [vmem:[%s6467_s25 + $0x2d] sm:$0xff] }
  0x7c   : > { %5593 = vmatprep.mubr.msk.f32.mxu1 %vm246_vm1, %v189_v61  ;;  %5846 = vmatprep.mubr.msk.f32.mxu0 %vm246_vm1, %v6565_v47  ;;  %v192_v47 = vld [vmem:[%s6467_s25 + $0xa8] sm:$0xff]  ;;  %v3112_v61 = vld [vmem:[%s6467_s25 + $0x35] sm:$0xff] }
  0x7f   : > { %5594 = vmatmul.mubr.msk.f32.gmra.mrb[18].mxu1 %vm246_vm1, %v190_v63  ;;  %5847 = vmatmul.mubr.msk.f32.vlgmr.msra.gmra.mrb[0].mxu0 %vm246_vm1, %v6579_v50  ;;  %v195_v50 = vld [vmem:[%s6467_s25 + $0xc0] sm:$0xff]  ;;  %v3989_v63 = vld [vmem:[%s8106_s2 + $0x98] sm:$0xff] }
  0x80   : > { %5901 = vmatpush3.msk.msra.mxu0 %vm355_vm0, %v6570_v48  ;;  %5596 = vmatprep.mubr.msk.f32.mxu1 %vm246_vm1, %v191_v2  ;;  %v194_v48 = vld [vmem:[%s6467_s25 + $0xb8] sm:$0xff]  ;;  %v3990_v2 = vld [vmem:[%s8106_s2 + $0xa0] sm:$0xff] }
  0x81   : > { %5849 = vmatprep.mubr.msk.f32.mxu0 %vm246_vm1, %v6585_v52  ;;  %5956 = vmatprep.subr.msk.mxu0 %vm355_vm0, %v6830_v4  ;;  %v196_v52 = vld [vmem:[%s6467_s25 + $0xc8] sm:$0xff] }
  0x83   : > { %5597 = vmatmul.mubr.msk.f32.gmra.mrb[20].mxu1 %vm246_vm1, %v192_v47  ;;  %5850 = vmatmul.mubr.msk.f32.gmra.mrb[2].mxu0 %vm246_vm1, %v6597_v54  ;;  %v197_v54 = vld [vmem:[%s6467_s25 + $0xd0] sm:$0xff] }
  0x84   : > { %5599 = vmatprep.mubr.msk.f32.mxu1 %vm246_vm1, %v193_v6  ;;  %5852 = vmatprep.mubr.msk.f32.mxu0 %vm246_vm1, %v6601_v56  ;;  %v198_v56 = vld [vmem:[%s6467_s25 + $0xd8] sm:$0xff]  ;;  %v7112_v47 = vld [vmem:[%s6467_s25 + $0xaa] sm:$0xff] }
  0x85   : > { %v3113_v6 = vld [vmem:[%s6467_s25 + $0x3d] sm:$0xff] }
  0x87   : > { %5600 = vmatmul.mubr.msk.f32.gmra.mrb[22].mxu1 %vm246_vm1, %v194_v48  ;;  %5853 = vmatmul.mubr.msk.f32.gmra.mrb[4].mxu0 %vm246_vm1, %v6611_v58  ;;  %v199_v58 = vld [vmem:[%s6467_s25 + $0xe0] sm:$0xff]  ;;  %v7117_v48 = vld [vmem:[%s6467_s25 + $0xb2] sm:$0xff] }
  0x88   : > { %5602 = vmatprep.mubr.msk.f32.mxu1 %vm246_vm1, %v195_v50  ;;  %5855 = vmatprep.mubr.msk.f32.mxu0 %vm246_vm1, %v6615_v60  ;;  %v200_v60 = vld [vmem:[%s6467_s25 + $0xe8] sm:$0xff] }
  0x89   : > { %v3114_v50 = vld [vmem:[%s6467_s25 + $0x45] sm:$0xff] }
  0x8b   : > { %5603 = vmatmul.mubr.msk.f32.gmra.mrb[24].mxu1 %vm246_vm1, %v196_v52  ;;  %5856 = vmatmul.mubr.msk.f32.gmra.mrb[6].mxu0 %vm246_vm1, %v6625_v62  ;;  %v201_v62 = vld [vmem:[%s6467_s25 + $0xf0] sm:$0xff] }
  0x8c   : > { %5605 = vmatprep.mubr.msk.f32.mxu1 %vm246_vm1, %v197_v54  ;;  %5858 = vmatprep.mubr.msk.f32.mxu0 %vm246_vm1, %v6629_v0  ;;  %v202_v0 = vld [vmem:[%s6467_s25 + $0xf8] sm:$0xff]  ;;  %v3992_v52 = vld [vmem:[%s8106_s2 + $0xb0] sm:$0xff] }
  0x8d   : > { %v7133_v54 = vld [vmem:[%s6467_s25 + $0xba] sm:$0xff] }
  0x8f   : > { %5606 = vmatmul.mubr.msk.f32.gmra.mrb[26].mxu1 %vm246_vm1, %v198_v56  ;;  %5859 = vmatmul.mubr.msk.f32.gmra.mrb[8].mxu0 %vm246_vm1, %v6639_v3  ;;  %v203_v3 = vld [vmem:[%s6467_s25 + $0x100] sm:$0xff]  ;;  %v3115_v56 = vld [vmem:[%s6467_s25 + $0x4d] sm:$0xff] }
  0x90   : > { %5608 = vmatprep.mubr.msk.f32.mxu1 %vm246_vm1, %v199_v58  ;;  %5861 = vmatprep.mubr.msk.f32.mxu0 %vm246_vm1, %v6643_v5  ;;  %v204_v5 = vld [vmem:[%s6467_s25 + $0x108] sm:$0xff] }
  0x91   : > { %v7137_v58 = vld [vmem:[%s6467_s25 + $0xc2] sm:$0xff] }
  0x93   : > { %5609 = vmatmul.mubr.msk.f32.gmra.mrb[28].mxu1 %vm246_vm1, %v200_v60  ;;  %5862 = vmatmul.mubr.msk.f32.gmra.mrb[10].mxu0 %vm246_vm1, %v6653_v7  ;;  %v205_v7 = vld [vmem:[%s6467_s25 + $0x110] sm:$0xff] }
  0x94   : > { %5611 = vmatprep.mubr.msk.f32.mxu1 %vm246_vm1, %v201_v62  ;;  %5864 = vmatprep.mubr.msk.f32.mxu0 %vm246_vm1, %v6657_v9  ;;  %v960_v9 = vld [vmem:[%s6467_s25 + $0x2] sm:$0xff]  ;;  %v3116_v60 = vld [vmem:[%s6467_s25 + $0x55] sm:$0xff] }
  0x95   : > { %v3993_v62 = vld [vmem:[%s8106_s2 + $0xb8] sm:$0xff] }
  0x97   : > { %5612 = vmatmul.mubr.msk.f32.gmra.mrb[30].mxu1 %vm246_vm1, %v202_v0  ;;  %5865 = vmatmul.mubr.msk.f32.gmra.mrb[12].mxu0 %vm246_vm1, %v6667_v12  ;;  %v3970_v12 = vld [vmem:[%s8106_s2] sm:$0xff] }
  0x98   : > { %5614 = vmatprep.mubr.msk.f32.mxu1 %vm246_vm1, %v203_v3  ;;  %5867 = vmatprep.mubr.msk.f32.mxu0 %vm246_vm1, %v6671_v14  ;;  %v6911_v14 = vld [vmem:[%s6467_s25 + $0x12] sm:$0xff]  ;;  %v3994_v0 = vld [vmem:[%s8106_s2 + $0xc0] sm:$0xff]  ;;  %v7153_v3 = vld [vmem:[%s6467_s25 + $0xca] sm:$0xff] }
  0x99   : > { %4008 = vperm.xlu0 %6319, %v3970_v12   ;;  %v7173_v12 = vld [vmem:[%s6467_s25 + $0xda] sm:$0xff] }
  0x9b   : > { %5615 = vmatmul.mubr.msk.f32.gmra.mrb[32].mxu1 %vm246_vm1, %v204_v5  ;;  %5868 = vmatmul.mubr.msk.f32.gmra.mrb[14].mxu0 %vm246_vm1, %v6681_v16  ;;  %v3971_v16 = vld [vmem:[%s8106_s2 + $0x8] sm:$0xff]  ;;  %v3117_v5 = vld [vmem:[%s6467_s25 + $0x5d] sm:$0xff] }
  0x9c   : > { %5617 = vmatprep.mubr.msk.f32.mxu1 %vm246_vm1, %v205_v7  ;;  %5870 = vmatprep.mubr.msk.f32.mxu0 %vm246_vm1, %v6685_v18  ;;  %v6932_v18 = vld [vmem:[%s6467_s25 + $0x22] sm:$0xff]  ;;  %v7157_v7 = vld [vmem:[%s6467_s25 + $0xd2] sm:$0xff] }
  0x9d   : > { %4013 = vperm.xlu0 %6319, %v3971_v16   ;;  %v3120_v16 = vld [vmem:[%s6467_s25 + $0x75] sm:$0xff] }
  0x9f   : > { %5618 = vmatmul.mubr.msk.f32.gmra.mrb[34].mxu1 %vm246_vm1, %v206_v8  ;;  %5871 = vmatmul.mubr.msk.f32.gmra.mrb[16].mxu0 %vm246_vm1, %v6695_v20  ;;  %v3974_v20 = vld [vmem:[%s8106_s2 + $0x20] sm:$0xff] }
  0xa0   : > { %5622 = vmatprep.mubr.msk.f32.mxu1 %vm246_vm1, %v960_v9  ;;  %5873 = vmatprep.mubr.msk.f32.mxu0 %vm246_vm1, %v6699_v22  ;;  %v3975_v22 = vld [vmem:[%s8106_s2 + $0x28] sm:$0xff] }
  0xa1   : > { %4028 = vperm.xlu0 %6319, %v3974_v20   ;;  %4033 = vperm.xlu1 %6320, %v3975_v22   ;;  %v3118_v8 = vld [vmem:[%s6467_s25 + $0x65] sm:$0xff] }
  0xa2   : > { %v3995_v9 = vld [vmem:[%s8106_s2 + $0xc8] sm:$0xff]  ;;  %v3998_v20 = vld [vmem:[%s8106_s2 + $0xe0] sm:$0xff] }
  0xa3   : > { %5623 = vmatmul.mubr.msk.f32.vlgmr.msra.gmra.mrb[0].mxu1 %vm246_vm1, %v961_v13  ;;  %5874 = vmatmul.mubr.msk.f32.gmra.mrb[18].mxu0 %vm246_vm1, %v6714_v25  ;;  %v6974_v25 = vld [vmem:[%s6467_s25 + $0x42] sm:$0xff]  ;;  %v3119_v13 = vld [vmem:[%s6467_s25 + $0x6d] sm:$0xff] }
  0xa4   : > { %5677 = vmatpush3.msk.msra.mxu1 %vm355_vm0, %v6704_v23  ;;  %5625 = vmatprep.mubr.msk.f32.mxu1 %vm246_vm1, %v6911_v14  ;;  %v3976_v23 = vld [vmem:[%s8106_s2 + $0x30] sm:$0xff] }
  0xa5   : > { %5876 = vmatprep.mubr.msk.f32.mxu0 %vm246_vm1, %v6720_v27  ;;  %6012 = vmatprep.subr.msk.mxu1 %vm355_vm0, %v6445_v1  ;;  %v6951_v1 = vld [vmem:[%s6467_s25 + $0x2a] sm:$0xff]  ;;  %v3978_v27 = vld [vmem:[%s8106_s2 + $0x40] sm:$0xff] }
  0xa6   : > { %4038 = vperm.xlu0 %6319, %v3976_v23   ;;  %4043 = vperm.xlu1 %6320, %v3977_v26   ;;  %v7193_v22 = vld [vmem:[%s6467_s25 + $0xea] sm:$0xff]  ;;  %v3121_v23 = vld [vmem:[%s6467_s25 + $0x7d] sm:$0xff]  ;;  %v7197_v26 = vld [vmem:[%s6467_s25 + $0xf2] sm:$0xff] }
  0xa7   : > { %5626 = vmatmul.mubr.msk.f32.gmra.mrb[2].mxu1 %vm246_vm1, %v6927_v17  ;;  %5877 = vmatmul.mubr.msk.f32.gmra.mrb[20].mxu0 %vm246_vm1, %v6732_v28  ;;  %v6994_v28 = vld [vmem:[%s6467_s25 + $0x52] sm:$0xff] }
  0xa8   : > { %5628 = vmatprep.mubr.msk.f32.mxu1 %vm246_vm1, %v6932_v18  ;;  %5879 = vmatprep.mubr.msk.f32.mxu0 %vm246_vm1, %v6736_v30  ;;  %v3980_v30 = vld [vmem:[%s8106_s2 + $0x50] sm:$0xff] }
  0xaa   : > { %4048 = vperm.xlu0 %6319, %v3978_v27   ;;  %4053 = vperm.xlu1 %6320, %v3979_v29   ;;  %v3122_v27 = vld [vmem:[%s6467_s25 + $0x85] sm:$0xff] }
  0xab   : > { %5629 = vmatmul.mubr.msk.f32.gmra.mrb[4].mxu1 %vm246_vm1, %v6951_v1  ;;  %5880 = vmatmul.mubr.msk.f32.gmra.mrb[22].mxu0 %vm246_vm1, %v6746_v32  ;;  %v7014_v32 = vld [vmem:[%s6467_s25 + $0x62] sm:$0xff] }
  0xac   : > { %5631 = vmatprep.mubr.msk.f32.mxu1 %vm246_vm1, %v6954_v21  ;;  %5882 = vmatprep.mubr.msk.f32.mxu0 %vm246_vm1, %v6750_v34  ;;  %v3982_v34 = vld [vmem:[%s8106_s2 + $0x60] sm:$0xff]  ;;  %v3999_v29 = vld [vmem:[%s8106_s2 + $0xe8] sm:$0xff] }
  0xae   : > { %4058 = vperm.xlu0 %6319, %v3980_v30   ;;  %4063 = vperm.xlu1 %6320, %v3981_v33   ;;  %v4000_v30 = vld [vmem:[%s8106_s2 + $0xf0] sm:$0xff]  ;;  %v7213_v33 = vld [vmem:[%s6467_s25 + $0xfa] sm:$0xff] }
  0xaf   : > { %5632 = vmatmul.mubr.msk.f32.gmra.mrb[6].mxu1 %vm246_vm1, %v6971_v24  ;;  %5883 = vmatmul.mubr.msk.f32.gmra.mrb[24].mxu0 %vm246_vm1, %v6760_v36  ;;  %v7034_v36 = vld [vmem:[%s6467_s25 + $0x72] sm:$0xff] }
  0xb0   : > { %5634 = vmatprep.mubr.msk.f32.mxu1 %vm246_vm1, %v6974_v25  ;;  %5885 = vmatprep.mubr.msk.f32.mxu0 %vm246_vm1, %v6764_v38  ;;  %v3984_v38 = vld [vmem:[%s8106_s2 + $0x70] sm:$0xff] }
  0xb2   : > { %4068 = vperm.xlu0 %6319, %v3982_v34   ;;  %4073 = vperm.xlu1 %6320, %v3983_v37   ;;  %v3123_v34 = vld [vmem:[%s6467_s25 + $0x8d] sm:$0xff]  ;;  %v7217_v37 = vld [vmem:[%s6467_s25 + $0x102] sm:$0xff] }
  0xb3   : > { %5635 = vmatmul.mubr.msk.f32.gmra.mrb[8].mxu1 %vm246_vm1, %v6991_v11  ;;  %5886 = vmatmul.mubr.msk.f32.gmra.mrb[26].mxu0 %vm246_vm1, %v6774_v40  ;;  %v7054_v40 = vld [vmem:[%s6467_s25 + $0x82] sm:$0xff] }
  0xb4   : > { %5637 = vmatprep.mubr.msk.f32.mxu1 %vm246_vm1, %v6994_v28  ;;  %5888 = vmatprep.mubr.msk.f32.mxu0 %vm246_vm1, %v6778_v42  ;;  %v3985_v42 = vld [vmem:[%s8106_s2 + $0x78] sm:$0xff] }
  0xb6   : > { %4078 = vperm.xlu0 %6319, %v3984_v38   ;;  %4083 = vperm.xlu1 %6320, %v3985_v42   ;;  %v3124_v38 = vld [vmem:[%s6467_s25 + $0x95] sm:$0xff]  ;;  %v4002_v42 = vld [vmem:[%s8106_s2 + $0x100] sm:$0xff] }
  0xb7   : > { %5638 = vmatmul.mubr.msk.f32.gmra.mrb[10].mxu1 %vm246_vm1, %v7011_v31  ;;  %5889 = vmatmul.mubr.msk.f32.gmra.mrb[28].mxu0 %vm246_vm1, %v6788_v44  ;;  %v7071_v44 = vld [vmem:[%s6467_s25 + $0x8a] sm:$0xff] }
  0xb8   : > { %5640 = vmatprep.mubr.msk.f32.mxu1 %vm246_vm1, %v7014_v32  ;;  %5891 = vmatprep.mubr.msk.f32.mxu0 %vm246_vm1, %v6792_v46  ;;  %v7075_v46 = vld [vmem:[%s6467_s25 + $0x92] sm:$0xff] }
  0xba   : > { %4088 = vperm.xlu0 %6319, %v3986_v43   ;;  %v7233_v43 = vld [vmem:[%s6467_s25 + $0x10a] sm:$0xff] }
  0xbb   : > { %5641 = vmatmul.mubr.msk.f32.gmra.mrb[12].mxu1 %vm246_vm1, %v7031_v35  ;;  %5892 = vmatmul.mubr.msk.f32.gmra.mrb[30].mxu0 %vm246_vm1, %v6802_v51  ;;  %v3987_v51 = vld [vmem:[%s8106_s2 + $0x88] sm:$0xff] }
  0xbc   : > { %5643 = vmatprep.mubr.msk.f32.mxu1 %vm246_vm1, %v7034_v36  ;;  %5894 = vmatprep.mubr.msk.f32.mxu0 %vm246_vm1, %v6806_v55  ;;  %v7091_v55 = vld [vmem:[%s6467_s25 + $0x9a] sm:$0xff] }
  0xbd   : > { %4093 = vperm.xlu1 %6320, %v3987_v51   ;;  %v3126_v51 = vld [vmem:[%s6467_s25 + $0xa5] sm:$0xff] }
  0xbe   : > { %4098 = vperm.xlu0 %6319, %v3988_v53   ;;  %v4003_v53 = vld [vmem:[%s8106_s2 + $0x108] sm:$0xff] }
  0xbf   : > { %5644 = vmatmul.mubr.msk.f32.gmra.mrb[14].mxu1 %vm246_vm1, %v7051_v39  ;;  %5895 = vmatmul.mubr.msk.f32.gmra.mrb[32].mxu0 %vm246_vm1, %v6816_v59  ;;  %v7095_v59 = vld [vmem:[%s6467_s25 + $0xa2] sm:$0xff] }
  0xc0   : > { %5646 = vmatprep.mubr.msk.f32.mxu1 %vm246_vm1, %v7054_v40  ;;  %5897 = vmatprep.mubr.msk.f32.mxu0 %vm246_vm1, %v2714_v41  ;;  %v4001_v41 = vld [vmem:[%s8106_s2 + $0xf8] sm:$0xff] }
  0xc1   : > { %4103 = vperm.xlu1 %6320, %v3989_v63   ;;  %v3127_v63 = vld [vmem:[%s6467_s25 + $0xad] sm:$0xff] }
  0xc2   : > { %4108 = vperm.xlu0 %6319, %v3990_v2   ;;  %v3128_v2 = vld [vmem:[%s6467_s25 + $0xb5] sm:$0xff] }
  0xc3   : > { %5647 = vmatmul.mubr.msk.f32.gmra.mrb[16].mxu1 %vm246_vm1, %v7071_v44  ;;  %5898 = vmatmul.mubr.msk.f32.gmra.mrb[34].mxu0 %vm246_vm1, %v2715_v45  ;;  %v3125_v45 = vld [vmem:[%s6467_s25 + $0x9d] sm:$0xff] }
  0xc4   : > { %5649 = vmatprep.mubr.msk.f32.mxu1 %vm246_vm1, %v7075_v46  ;;  %5902 = vmatprep.mubr.msk.f32.mxu0 %vm246_vm1, %v3110_v49  ;;  %v7237_v49 = vld [vmem:[%s6467_s25 + $0x112] sm:$0xff] }
  0xc6   : > { %4118 = vperm.xlu0 %6319, %v3992_v52   ;;  %v6395_v52 = vld [vmem:[%s8105_s1 + $0x10] sm:$0xf] }
  0xc7   : > { %5650 = vmatmul.mubr.msk.f32.gmra.mrb[18].mxu1 %vm246_vm1, %v7091_v55  ;;  %5903 = vmatmul.mubr.msk.f32.vlgmr.msra.gmra.mrb[0].mxu0 %vm246_vm1, %v3111_v57  ;;  %v4004_v57 = vld [vmem:[%s8106_s2 + $0x110] sm:$0xff] }
  0xc8   : > { %5957 = vmatpush3.msk.msra.mxu0 %vm355_vm0, %v6830_v4  ;;  %5652 = vmatprep.mubr.msk.f32.mxu1 %vm246_vm1, %v7095_v59  ;;  %v3991_v4 = vld [vmem:[%s8106_s2 + $0xa8] sm:$0xff] }
  0xc9   : > { %5905 = vmatprep.mubr.msk.f32.mxu0 %vm246_vm1, %v3112_v61  ;;  %4113 = vperm.xlu1 %6320, %v3991_v4   ;;  %v7253_v61 = vld [vmem:[%s6467_s25 + $0x11a] sm:$0xff]  ;;  %v3130_v4 = vld [vmem:[%s6467_s25 + $0xc5] sm:$0xff] }
  0xca   : > { %4128 = vperm.xlu0 %6319, %v3994_v0   ;;  %v3551_v0 = vld [vmem:[%s6467_s25 + $0x7e] sm:$0xff] }
  0xcb   : > { %5653 = vmatmul.mubr.msk.f32.gmra.mrb[20].mxu1 %vm246_vm1, %v7112_v47  ;;  %5906 = vmatmul.mubr.msk.f32.gmra.mrb[2].mxu0 %vm246_vm1, %v3113_v6  ;;  %v4005_v6 = vld [vmem:[%s8106_s2 + $0x118] sm:$0xff] }
  0xcc   : > { %5655 = vmatprep.mubr.msk.f32.mxu1 %vm246_vm1, %v7117_v48  ;;  %5908 = vmatprep.mubr.msk.f32.mxu0 %vm246_vm1, %v3114_v50  ;;  %v3129_v50 = vld [vmem:[%s6467_s25 + $0xbd] sm:$0xff] }
  0xcd   : > { %4123 = vperm.xlu1 %6320, %v3993_v62   ;;  %v3550_v62 = vld [vmem:[%s6467_s25 + $0x76] sm:$0xff] }
  0xce   : > { %4138 = vperm.xlu0 %6319, %v3996_v10   ;;  %v3556_v10 = vld [vmem:[%s6467_s25 + $0xa6] sm:$0xff] }
  0xcf   : > { %5656 = vmatmul.mubr.msk.f32.gmra.mrb[22].mxu1 %vm246_vm1, %v7133_v54  ;;  %5909 = vmatmul.mubr.msk.f32.gmra.mrb[4].mxu0 %vm246_vm1, %v3115_v56  ;;  %v3132_v56 = vld [vmem:[%s6467_s25 + $0xd5] sm:$0xff] }
  0xd0   : > { %5658 = vmatprep.mubr.msk.f32.mxu1 %vm246_vm1, %v7137_v58  ;;  %5911 = vmatprep.mubr.msk.f32.mxu0 %vm246_vm1, %v3116_v60  ;;  %v3134_v60 = vld [vmem:[%s6467_s25 + $0xe5] sm:$0xff] }
  0xd1   : > { %4133 = vperm.xlu1 %6320, %v3995_v9   ;;  %v1424_v9 = vld [vmem:[%s6467_s25 + $0x122] sm:$0xff] }
  0xd2   : > { %4148 = vperm.xlu0 %6319, %v3998_v20   ;;  %v3559_v20 = vld [vmem:[%s6467_s25 + $0xbe] sm:$0xff] }
  0xd3   : > { %5659 = vmatmul.mubr.msk.f32.gmra.mrb[24].mxu1 %vm246_vm1, %v7153_v3  ;;  %5912 = vmatmul.mubr.msk.f32.gmra.mrb[6].mxu0 %vm246_vm1, %v3117_v5  ;;  %v3553_v5 = vld [vmem:[%s6467_s25 + $0x8e] sm:$0xff] }
  0xd4   : > { %5661 = vmatprep.mubr.msk.f32.mxu1 %vm246_vm1, %v7157_v7  ;;  %5914 = vmatprep.mubr.msk.f32.mxu0 %vm246_vm1, %v3118_v8  ;;  %v3555_v8 = vld [vmem:[%s6467_s25 + $0x9e] sm:$0xff] }
  0xd5   : > { %4143 = vperm.xlu1 %6320, %v3997_v19   ;;  %v1839_v19 = vld [vmem:[%s6467_s25 + $0xab] sm:$0xff] }
  0xd6   : > { %4158 = vperm.xlu0 %6319, %v4000_v30   ;;  %v3562_v30 = vld [vmem:[%s6467_s25 + $0xd6] sm:$0xff] }
  0xd7   : > { %5662 = vmatmul.mubr.msk.f32.gmra.mrb[26].mxu1 %vm246_vm1, %v7173_v12  ;;  %5915 = vmatmul.mubr.msk.f32.gmra.mrb[8].mxu0 %vm246_vm1, %v3119_v13  ;;  %v3557_v13 = vld [vmem:[%s6467_s25 + $0xae] sm:$0xff] }
  0xd8   : > { %5664 = vmatprep.mubr.msk.f32.mxu1 %vm246_vm1, %v7177_v15  ;;  %5917 = vmatprep.mubr.msk.f32.mxu0 %vm246_vm1, %v3120_v16  ;;  %v3558_v16 = vld [vmem:[%s6467_s25 + $0xb6] sm:$0xff] }
  0xd9   : > { %4153 = vperm.xlu1 %6320, %v3999_v29   ;;  %v1842_v29 = vld [vmem:[%s6467_s25 + $0xc3] sm:$0xff] }
  0xda   : > { %4168 = vperm.xlu0 %6319, %v4002_v42   ;;  %v3565_v42 = vld [vmem:[%s6467_s25 + $0xee] sm:$0xff] }
  0xdb   : > { %5665 = vmatmul.mubr.msk.f32.gmra.mrb[28].mxu1 %vm246_vm1, %v7193_v22  ;;  %5918 = vmatmul.mubr.msk.f32.gmra.mrb[10].mxu0 %vm246_vm1, %v3121_v23  ;;  %v3560_v23 = vld [vmem:[%s6467_s25 + $0xc6] sm:$0xff] }
  0xdc   : > { %5667 = vmatprep.mubr.msk.f32.mxu1 %vm246_vm1, %v7197_v26  ;;  %5920 = vmatprep.mubr.msk.f32.mxu0 %vm246_vm1, %v3122_v27  ;;  %v3561_v27 = vld [vmem:[%s6467_s25 + $0xce] sm:$0xff] }
  0xdd   : > { %4163 = vperm.xlu1 %6320, %v4001_v41   ;;  %v1845_v41 = vld [vmem:[%s6467_s25 + $0xdb] sm:$0xff] }
  0xde   : > { %4178 = vperm.xlu0 %6319, %v4004_v57   ;;  %v3568_v57 = vld [vmem:[%s6467_s25 + $0x106] sm:$0xff] }
  0xdf   : > { %5668 = vmatmul.mubr.msk.f32.gmra.mrb[30].mxu1 %vm246_vm1, %v7213_v33  ;;  %5921 = vmatmul.mubr.msk.f32.gmra.mrb[12].mxu0 %vm246_vm1, %v3123_v34  ;;  %v3563_v34 = vld [vmem:[%s6467_s25 + $0xde] sm:$0xff] }
  0xe0   : > { %5670 = vmatprep.mubr.msk.f32.mxu1 %vm246_vm1, %v7217_v37  ;;  %5923 = vmatprep.mubr.msk.f32.mxu0 %vm246_vm1, %v3124_v38  ;;  %v3564_v38 = vld [vmem:[%s6467_s25 + $0xe6] sm:$0xff] }
  0xe1   : > { %4173 = vperm.xlu1 %6320, %v4003_v53   ;;  %v1848_v53 = vld [vmem:[%s6467_s25 + $0xf3] sm:$0xff] }
  0xe3   : > { %5671 = vmatmul.mubr.msk.f32.gmra.mrb[32].mxu1 %vm246_vm1, %v7233_v43  ;;  %5924 = vmatmul.mubr.msk.f32.gmra.mrb[14].mxu0 %vm246_vm1, %v3125_v45  ;;  %v3566_v45 = vld [vmem:[%s6467_s25 + $0xf6] sm:$0xff] }
  0xe4   : > { %5673 = vmatprep.mubr.msk.f32.mxu1 %vm246_vm1, %v7237_v49  ;;  %5926 = vmatprep.mubr.msk.f32.mxu0 %vm246_vm1, %v3126_v51  ;;  %v3567_v51 = vld [vmem:[%s6467_s25 + $0xfe] sm:$0xff] }
  0xe5   : > { %4183 = vperm.xlu1 %6320, %v4005_v6   ;;  %v3570_v6 = vld [vmem:[%s6467_s25 + $0x116] sm:$0xff] }
  0xe7   : > { %5674 = vmatmul.mubr.msk.f32.gmra.mrb[34].mxu1 %vm246_vm1, %v7253_v61  ;;  %5927 = vmatmul.mubr.msk.f32.gmra.mrb[16].mxu0 %vm246_vm1, %v3127_v63  ;;  %v3569_v63 = vld [vmem:[%s6467_s25 + $0x10e] sm:$0xff] }
  0xe8   : > { %5678 = vmatprep.mubr.msk.f32.mxu1 %vm246_vm1, %v6911_v14  ;;  %5929 = vmatprep.mubr.msk.f32.mxu0 %vm246_vm1, %v3128_v2  ;;  %v3131_v14 = vld [vmem:[%s6467_s25 + $0xcd] sm:$0xff]  ;;  %v1850_v2 = vld [vmem:[%s6467_s25 + $0x103] sm:$0xff] }
  0xeb   : > { %5679 = vmatmul.mubr.msk.f32.vlgmr.msra.gmra.mrb[0].mxu1 %vm246_vm1, %v6927_v17  ;;  %5930 = vmatmul.mubr.msk.f32.gmra.mrb[18].mxu0 %vm246_vm1, %v3129_v50  ;;  %v3133_v17 = vld [vmem:[%s6467_s25 + $0xdd] sm:$0xff]  ;;  %v1851_v50 = vld [vmem:[%s6467_s25 + $0x10b] sm:$0xff] }
  0xec   : > { %6013 = vmatpush3.msk.msra.mxu1 %vm355_vm0, %v6395_v52  ;;  %5681 = vmatprep.mubr.msk.f32.mxu1 %vm246_vm1, %v6932_v18  ;;  %v3135_v18 = vld [vmem:[%s6467_s25 + $0xed] sm:$0xff] }
  0xed   : > { %5932 = vmatprep.mubr.msk.f32.mxu0 %vm246_vm1, %v3130_v4  ;;  %v3571_v4 = vld [vmem:[%s6467_s25 + $0x11e] sm:$0xff]  ;;  %v1852_v52 = vld [vmem:[%s6467_s25 + $0x113] sm:$0xff] }
  0xef   : > { %5682 = vmatmul.mubr.msk.f32.gmra.mrb[2].mxu1 %vm246_vm1, %v6951_v1  ;;  %5933 = vmatmul.mubr.msk.f32.gmra.mrb[20].mxu0 %vm246_vm1, %v3131_v14  ;;  %v3136_v1 = vld [vmem:[%s6467_s25 + $0xf5] sm:$0xff]  ;;  %v3572_v14 = vld [vmem:[%s6467_s25 + $0x126] sm:$0xff] }
  0xf0   : > { %5684 = vmatprep.mubr.msk.f32.mxu1 %vm246_vm1, %v6954_v21  ;;  %5935 = vmatprep.mubr.msk.f32.mxu0 %vm246_vm1, %v3132_v56  ;;  %v3137_v21 = vld [vmem:[%s6467_s25 + $0xfd] sm:$0xff] }
  0xf1   : > { %v1853_v56 = vld [vmem:[%s6467_s25 + $0x11b] sm:$0xff] }
  0xf3   : > { %5685 = vmatmul.mubr.msk.f32.gmra.mrb[4].mxu1 %vm246_vm1, %v6971_v24  ;;  %5936 = vmatmul.mubr.msk.f32.gmra.mrb[22].mxu0 %vm246_vm1, %v3133_v17  ;;  %v3138_v24 = vld [vmem:[%s6467_s25 + $0x105] sm:$0xff]  ;;  %v3573_v17 = vld [vmem:[%s6467_s25 + $0x12e] sm:$0xff] }
  0xf4   : > { %5687 = vmatprep.mubr.msk.f32.mxu1 %vm246_vm1, %v6974_v25  ;;  %5938 = vmatprep.mubr.msk.f32.mxu0 %vm246_vm1, %v3134_v60  ;;  %v3139_v25 = vld [vmem:[%s6467_s25 + $0x10d] sm:$0xff]  ;;  %v1854_v60 = vld [vmem:[%s6467_s25 + $0x123] sm:$0xff] }
  0xf7   : > { %5688 = vmatmul.mubr.msk.f32.gmra.mrb[6].mxu1 %vm246_vm1, %v6991_v11  ;;  %5939 = vmatmul.mubr.msk.f32.gmra.mrb[24].mxu0 %vm246_vm1, %v3135_v18  ;;  %v3140_v11 = vld [vmem:[%s6467_s25 + $0x115] sm:$0xff] }
  0xf8   : > { %5690 = vmatprep.mubr.msk.f32.mxu1 %vm246_vm1, %v6994_v28  ;;  %5941 = vmatprep.mubr.msk.f32.mxu0 %vm246_vm1, %v3136_v1  ;;  %v3141_v28 = vld [vmem:[%s6467_s25 + $0x11d] sm:$0xff]  ;;  %v1855_v1 = vld [vmem:[%s6467_s25 + $0x12b] sm:$0xff] }
  0xf9   : > { %v3574_v18 = vld [vmem:[%s6467_s25 + $0x136] sm:$0xff] }
  0xfb   : > { %5691 = vmatmul.mubr.msk.f32.gmra.mrb[8].mxu1 %vm246_vm1, %v7011_v31  ;;  %5942 = vmatmul.mubr.msk.f32.gmra.mrb[26].mxu0 %vm246_vm1, %v3137_v21  ;;  %v3142_v31 = vld [vmem:[%s6467_s25 + $0x125] sm:$0xff] }
  0xfc   : > { %5693 = vmatprep.mubr.msk.f32.mxu1 %vm246_vm1, %v7014_v32  ;;  %5944 = vmatprep.mubr.msk.f32.mxu0 %vm246_vm1, %v3138_v24  ;;  %v3143_v32 = vld [vmem:[%s6467_s25 + $0x12d] sm:$0xff]  ;;  %v3575_v21 = vld [vmem:[%s6467_s25 + $0x13e] sm:$0xff] }
  0xff   : > { %5694 = vmatmul.mubr.msk.f32.gmra.mrb[10].mxu1 %vm246_vm1, %v7031_v35  ;;  %5945 = vmatmul.mubr.msk.f32.gmra.mrb[28].mxu0 %vm246_vm1, %v3139_v25  ;;  %v3144_v35 = vld [vmem:[%s6467_s25 + $0x135] sm:$0xff]  ;;  %v4019_v25 = vpop.permute.xlu1 %4018 }
 0x100   : > { %5696 = vmatprep.mubr.msk.f32.mxu1 %vm246_vm1, %v7034_v36  ;;  %5947 = vmatprep.mubr.msk.f32.mxu0 %vm246_vm1, %v3140_v11  ;;  %v3145_v36 = vld [vmem:[%s6467_s25 + $0x13d] sm:$0xff] }
 0x103   : > { %5697 = vmatmul.mubr.msk.f32.gmra.mrb[12].mxu1 %vm246_vm1, %v7051_v39  ;;  %5948 = vmatmul.mubr.msk.f32.gmra.mrb[30].mxu0 %vm246_vm1, %v3141_v28  ;;  %v3540_v39 = vld [vmem:[%s6467_s25 + $0x26] sm:$0xff] }
 0x104   : > { %5699 = vmatprep.mubr.msk.f32.mxu1 %vm246_vm1, %v7054_v40  ;;  %5950 = vmatprep.mubr.msk.f32.mxu0 %vm246_vm1, %v3142_v31  ;;  %v3541_v40 = vld [vmem:[%s6467_s25 + $0x2e] sm:$0xff] }
 0x107   : > { %5700 = vmatmul.mubr.msk.f32.gmra.mrb[14].mxu1 %vm246_vm1, %v7071_v44  ;;  %5951 = vmatmul.mubr.msk.f32.gmra.mrb[32].mxu0 %vm246_vm1, %v3143_v32  ;;  %v3542_v44 = vld [vmem:[%s6467_s25 + $0x36] sm:$0xff]  ;;  %v4024_v32 = vpop.permute.xlu1 %4023 }
 0x108   : > { %5702 = vmatprep.mubr.msk.f32.mxu1 %vm246_vm1, %v7075_v46  ;;  %5953 = vmatprep.mubr.msk.f32.mxu0 %vm246_vm1, %v3144_v35  ;;  %v3543_v46 = vld [vmem:[%s6467_s25 + $0x3e] sm:$0xff] }
 0x10b   : > { %5703 = vmatmul.mubr.msk.f32.gmra.mrb[16].mxu1 %vm246_vm1, %v7091_v55  ;;  %5954 = vmatmul.mubr.msk.f32.gmra.mrb[34].mxu0 %vm246_vm1, %v3145_v36  ;;  %v3544_v55 = vld [vmem:[%s6467_s25 + $0x46] sm:$0xff] }
 0x10c   : > { %5705 = vmatprep.mubr.msk.f32.mxu1 %vm246_vm1, %v7095_v59  ;;  %5958 = vmatprep.mubr.msk.f32.mxu0 %vm246_vm1, %v3540_v39  ;;  %v3545_v59 = vld [vmem:[%s6467_s25 + $0x4e] sm:$0xff] }
 0x10f   : > { %5706 = vmatmul.mubr.msk.f32.gmra.mrb[18].mxu1 %vm246_vm1, %v7112_v47  ;;  %5959 = vmatmul.mubr.msk.f32.vlgmr.msra.gmra.mrb[0].mxu0 %vm246_vm1, %v3541_v40  ;;  %v3546_v47 = vld [vmem:[%s6467_s25 + $0x56] sm:$0xff] }
 0x110   : > { %5708 = vmatprep.mubr.msk.f32.mxu1 %vm246_vm1, %v7117_v48  ;;  %5961 = vmatprep.mubr.msk.f32.mxu0 %vm246_vm1, %v3542_v44  ;;  %v3547_v48 = vld [vmem:[%s6467_s25 + $0x5e] sm:$0xff] }
 0x113   : > { %5709 = vmatmul.mubr.msk.f32.gmra.mrb[20].mxu1 %vm246_vm1, %v7133_v54  ;;  %5962 = vmatmul.mubr.msk.f32.gmra.mrb[2].mxu0 %vm246_vm1, %v3543_v46  ;;  %v3548_v54 = vld [vmem:[%s6467_s25 + $0x66] sm:$0xff] }
 0x114   : > { %5711 = vmatprep.mubr.msk.f32.mxu1 %vm246_vm1, %v7137_v58  ;;  %5964 = vmatprep.mubr.msk.f32.mxu0 %vm246_vm1, %v3544_v55  ;;  %v3549_v58 = vld [vmem:[%s6467_s25 + $0x6e] sm:$0xff] }
 0x117   : > { %5712 = vmatmul.mubr.msk.f32.gmra.mrb[22].mxu1 %vm246_vm1, %v7153_v3  ;;  %5965 = vmatmul.mubr.msk.f32.gmra.mrb[4].mxu0 %vm246_vm1, %v3545_v59  ;;  %v3552_v3 = vld [vmem:[%s6467_s25 + $0x86] sm:$0xff] }
 0x118   : > { %5714 = vmatprep.mubr.msk.f32.mxu1 %vm246_vm1, %v7157_v7  ;;  %5967 = vmatprep.mubr.msk.f32.mxu0 %vm246_vm1, %v3546_v47  ;;  %v3554_v7 = vld [vmem:[%s6467_s25 + $0x96] sm:$0xff]  ;;  %v4009_v24 = vpop.permute.xlu0 %4008 }
 0x11b   : > { %5715 = vmatmul.mubr.msk.f32.gmra.mrb[24].mxu1 %vm246_vm1, %v7173_v12  ;;  %5968 = vmatmul.mubr.msk.f32.gmra.mrb[6].mxu0 %vm246_vm1, %v3547_v48  ;;  %v1425_v12 = vld [vmem:[%s6467_s25 + $0x12a] sm:$0xff] }
 0x11c   : > { %5717 = vmatprep.mubr.msk.f32.mxu1 %vm246_vm1, %v7177_v15  ;;  %5970 = vmatprep.mubr.msk.f32.mxu0 %vm246_vm1, %v3548_v54  ;;  %v1838_v15 = vld [vmem:[%s6467_s25 + $0xa3] sm:$0xff]  ;;  %v4014_v31 = vpop.permute.xlu0 %4013 }
 0x11f   : > { %5718 = vmatmul.mubr.msk.f32.gmra.mrb[26].mxu1 %vm246_vm1, %v7193_v22  ;;  %5971 = vmatmul.mubr.msk.f32.gmra.mrb[8].mxu0 %vm246_vm1, %v3549_v58  ;;  %v1840_v22 = vld [vmem:[%s6467_s25 + $0xb3] sm:$0xff] }
 0x120   : > { %5720 = vmatprep.mubr.msk.f32.mxu1 %vm246_vm1, %v7197_v26  ;;  %5973 = vmatprep.mubr.msk.f32.mxu0 %vm246_vm1, %v3550_v62  ;;  %v1841_v26 = vld [vmem:[%s6467_s25 + $0xbb] sm:$0xff]  ;;  %v4029_v39 = vpop.permute.xlu0 %4028  ;;  %v4034_v44 = vpop.permute.xlu1 %4033 }
 0x123   : > { %5721 = vmatmul.mubr.msk.f32.gmra.mrb[28].mxu1 %vm246_vm1, %v7213_v33  ;;  %5974 = vmatmul.mubr.msk.f32.gmra.mrb[10].mxu0 %vm246_vm1, %v3551_v0  ;;  %v1843_v33 = vld [vmem:[%s6467_s25 + $0xcb] sm:$0xff] }
 0x124   : > { %5723 = vmatprep.mubr.msk.f32.mxu1 %vm246_vm1, %v7217_v37  ;;  %5976 = vmatprep.mubr.msk.f32.mxu0 %vm246_vm1, %v3552_v3  ;;  %v1844_v37 = vld [vmem:[%s6467_s25 + $0xd3] sm:$0xff] }
 0x125   : > { %v7486_v47 = vpop.permute.xlu0 %4038  ;;  %v7488_v48 = vpop.permute.xlu1 %4043 }
 0x127   : > { %5724 = vmatmul.mubr.msk.f32.gmra.mrb[30].mxu1 %vm246_vm1, %v7233_v43  ;;  %5977 = vmatmul.mubr.msk.f32.gmra.mrb[12].mxu0 %vm246_vm1, %v3553_v5  ;;  %v1846_v43 = vld [vmem:[%s6467_s25 + $0xe3] sm:$0xff] }
 0x128   : > { %5726 = vmatprep.mubr.msk.f32.mxu1 %vm246_vm1, %v7237_v49  ;;  %5979 = vmatprep.mubr.msk.f32.mxu0 %vm246_vm1, %v3554_v7  ;;  %v1847_v49 = vld [vmem:[%s6467_s25 + $0xeb] sm:$0xff] }
 0x129   : > { %v7494_v62 = vpop.permute.xlu0 %4048  ;;  %v7498_v3 = vpop.permute.xlu1 %4053 }
 0x12b   : > { %5727 = vmatmul.mubr.msk.f32.gmra.mrb[32].mxu1 %vm246_vm1, %v7253_v61  ;;  %5980 = vmatmul.mubr.msk.f32.gmra.mrb[14].mxu0 %vm246_vm1, %v3555_v8  ;;  %v1849_v61 = vld [vmem:[%s6467_s25 + $0xfb] sm:$0xff]  ;;  %s6405_s25 = smov 124  }
 0x12c   : > { %5729 = vmatprep.mubr.msk.f32.mxu1 %vm246_vm1, %v1424_v9  ;;  %5982 = vmatprep.mubr.msk.f32.mxu0 %vm246_vm1, %v3556_v10 }
 0x12d   : > { %v7506_v9 = vpop.permute.xlu0 %4058  ;;  %v7508_v10 = vpop.permute.xlu1 %4063 }
 0x12f   : > { %5730 = vmatmul.mubr.msk.f32.gmra.mrb[34].mxu1 %vm246_vm1, %v1425_v12  ;;  %5983 = vmatmul.mubr.msk.f32.gmra.mrb[16].mxu0 %vm246_vm1, %v3557_v13 }
 0x130   : > { %5761 = vmatprep.mubr.msk.f32.mxu1 %vm246_vm1, %v1838_v15  ;;  %5985 = vmatprep.mubr.msk.f32.mxu0 %vm246_vm1, %v3558_v16 }
 0x131   : > { %v7514_v15 = vpop.permute.xlu0 %4068 }
 0x133   : > { %5762 = vmatmul.mubr.msk.f32.vlgmr.msra.gmra.mrb[18].mxu1 %vm246_vm1, %v1839_v19  ;;  %5986 = vmatmul.mubr.msk.f32.gmra.mrb[18].mxu0 %vm246_vm1, %v3559_v20  ;;  %v7518_v19 = vpop.permute.xlu1 %4073 }
 0x134   : > { %5764 = vmatprep.mubr.msk.f32.mxu1 %vm246_vm1, %v1840_v22  ;;  %5988 = vmatprep.mubr.msk.f32.mxu0 %vm246_vm1, %v3560_v23 }
 0x137   : > { %5765 = vmatmul.mubr.msk.f32.gmra.mrb[20].mxu1 %vm246_vm1, %v1841_v26  ;;  %5989 = vmatmul.mubr.msk.f32.gmra.mrb[20].mxu0 %vm246_vm1, %v3561_v27  ;;  %v7524_v27 = vpop.permute.xlu0 %4078 }
 0x138   : > { %5767 = vmatprep.mubr.msk.f32.mxu1 %vm246_vm1, %v1842_v29  ;;  %5991 = vmatprep.mubr.msk.f32.mxu0 %vm246_vm1, %v3562_v30  ;;  %v7528_v30 = vpop.permute.xlu1 %4083 }
 0x13b   : > { %5768 = vmatmul.mubr.msk.f32.gmra.mrb[22].mxu1 %vm246_vm1, %v1843_v33  ;;  %5992 = vmatmul.mubr.msk.f32.gmra.mrb[22].mxu0 %vm246_vm1, %v3563_v34 }
 0x13c   : > { %5770 = vmatprep.mubr.msk.f32.mxu1 %vm246_vm1, %v1844_v37  ;;  %5994 = vmatprep.mubr.msk.f32.mxu0 %vm246_vm1, %v3564_v38 }
 0x13f   : > { %5771 = vmatmul.mubr.msk.f32.gmra.mrb[24].mxu1 %vm246_vm1, %v1845_v41  ;;  %5995 = vmatmul.mubr.msk.f32.gmra.mrb[24].mxu0 %vm246_vm1, %v3565_v42 }
 0x140   : > { %5773 = vmatprep.mubr.msk.f32.mxu1 %vm246_vm1, %v1846_v43  ;;  %5997 = vmatprep.mubr.msk.f32.mxu0 %vm246_vm1, %v3566_v45 }
 0x143   : > { %5774 = vmatmul.mubr.msk.f32.gmra.mrb[26].mxu1 %vm246_vm1, %v1847_v49  ;;  %5998 = vmatmul.mubr.msk.f32.gmra.mrb[26].mxu0 %vm246_vm1, %v3567_v51 }
 0x144   : > { %5776 = vmatprep.mubr.msk.f32.mxu1 %vm246_vm1, %v1848_v53  ;;  %6000 = vmatprep.mubr.msk.f32.mxu0 %vm246_vm1, %v3568_v57  ;;  %v7541_v57 = vpop.permute.xlu0 %4088 }
 0x147   : > { %5777 = vmatmul.mubr.msk.f32.gmra.mrb[28].mxu1 %vm246_vm1, %v1849_v61  ;;  %6001 = vmatmul.mubr.msk.f32.gmra.mrb[28].mxu0 %vm246_vm1, %v3569_v63 }
 0x148   : > { %5779 = vmatprep.mubr.msk.f32.mxu1 %vm246_vm1, %v1850_v2  ;;  %6003 = vmatprep.mubr.msk.f32.mxu0 %vm246_vm1, %v3570_v6 }
 0x14b   : > { %5780 = vmatmul.mubr.msk.f32.gmra.mrb[30].mxu1 %vm246_vm1, %v1851_v50  ;;  %6004 = vmatmul.mubr.msk.f32.gmra.mrb[30].mxu0 %vm246_vm1, %v3571_v4  ;;  %v7546_v50 = vpop.permute.xlu1 %4093 }
 0x14c   : > { %5782 = vmatprep.mubr.msk.f32.mxu1 %vm246_vm1, %v1852_v52  ;;  %6006 = vmatprep.mubr.msk.f32.mxu0 %vm246_vm1, %v3572_v14 }
 0x14f   : > { %5783 = vmatmul.mubr.msk.f32.gmra.mrb[32].mxu1 %vm246_vm1, %v1853_v56  ;;  %6007 = vmatmul.mubr.msk.f32.gmra.mrb[32].mxu0 %vm246_vm1, %v3573_v17 }
 0x150   : > { %5785 = vmatprep.mubr.msk.f32.mxu1 %vm246_vm1, %v1854_v60  ;;  %6009 = vmatprep.mubr.msk.f32.mxu0 %vm246_vm1, %v3574_v18 }
 0x153   : > { %5786 = vmatmul.mubr.msk.f32.gmra.mrb[34].mxu1 %vm246_vm1, %v1855_v1  ;;  %6010 = vmatmul.mubr.msk.f32.gmra.mrb[34].mxu0 %vm246_vm1, %v3575_v21 }
 0x1be   : > { %v5680_v11 = vpop.f32.mrb[0].mxu1 }
 0x1bf   : > { %v1605_v28 = vpop.f32.mrb[1].mxu1 }
 0x1c2   : > { %v5683_v35 = vpop.f32.mrb[2].mxu1 }
 0x1c3   : > { %v1615_v36 = vpop.f32.mrb[3].mxu1 }
 0x1c6   : > { %v5686_v40 = vpop.f32.mrb[4].mxu1 }
 0x1c7   : > { %v1625_v46 = vpop.f32.mrb[5].mxu1 }
 0x1ca   : > { %v7482_v55 = vpop.f32.mrb[6].mxu1 }
 0x1cb   : > { %v7484_v59 = vpop.f32.mrb[7].mxu1 }
 0x1ce   : > { %v7490_v54 = vpop.f32.mrb[8].mxu1 }
 0x1cf   : > { %v7492_v58 = vpop.f32.mrb[9].mxu1 }
 0x1d2   : > { %v7496_v0 = vpop.f32.mrb[10].mxu1 }
 0x1d3   : > { %v7500_v5 = vpop.f32.mrb[11].mxu1 }
 0x1d6   : > { %v7502_v7 = vpop.f32.mrb[12].mxu1 }
 0x1d7   : > { %v7504_v8 = vpop.f32.mrb[13].mxu1 }
 0x1da   : > { %v7510_v12 = vpop.f32.mrb[14].mxu1 }
 0x1db   : > { %v7512_v13 = vpop.f32.mrb[15].mxu1 }
 0x1de   : > { %v7516_v16 = vpop.f32.mrb[16].mxu1 }
 0x1df   : > { %v7520_v20 = vpop.f32.mrb[17].mxu1 }
 0x1e2   : > { %v5960_v22 = vpop.f32.mrb[0].mxu0 }
 0x1e3   : > { %v7522_v23 = vadd.f32 %v5960_v22, %v5680_v11  ;;  %v3755_v26 = vpop.f32.mrb[1].mxu0 }
 0x1e4   : > { %v7526_v29 = vadd.f32 %v3755_v26, %v1605_v28 }
 0x1e5   : > { %v4187_v33 = vmul.f32 %v7522_v23, %v4014_v31 }
 0x1e6   : > { %v4186_v34 = vmul.f32 %v7526_v29, %v4009_v24  ;;  %v5963_v37 = vpop.f32.mrb[2].mxu0 }
 0x1e7   : > { %v4301_v38 = vmul.f32 %v7522_v23, %v4187_v33  ;;  %v7533_v41 = vadd.f32 %v5963_v37, %v5683_v35  ;;  %v3765_v42 = vpop.f32.mrb[3].mxu0  ;;  %v4224_v43 = vsel %vm4222_vm2, %v4187_v33, 0.0 }
 0x1e8   : > { %v4223_v45 = vsel %vm4222_vm2, %v4186_v34, 0.0  ;;  %v4300_v49 = vmul.f32 %v7526_v29, %v4186_v34  ;;  %v7538_v51 = vadd.f32 %v3765_v42, %v1615_v36 }
 0x1e9   : > { %v4189_v53 = vmul.f32 %v7533_v41, %v4024_v32  ;;  %v4337_v61 = vsel %vm4222_vm2, %v4301_v38, 0.0  ;;  %v4225_v4 = vadd.f32 %v4224_v43, %v4223_v45 }
 0x1ea   : > { %v4336_v63 = vsel %vm4222_vm2, %v4300_v49, 0.0  ;;  %v4188_v2 = vmul.f32 %v7538_v51, %v4019_v25  ;;  %v5966_v6 = vpop.f32.mrb[4].mxu0 }
 0x1eb   : > { %v4303_v52 = vmul.f32 %v7533_v41, %v4189_v53  ;;  %v7549_v14 = vadd.f32 %v5966_v6, %v5686_v40  ;;  %v3775_v56 = vpop.f32.mrb[5].mxu0  ;;  %v4338_v1 = vadd.f32 %v4337_v61, %v4336_v63  ;;  %v4228_v25 = vsel %vm4222_vm2, %v4189_v53, 0.0 }
 0x1ec   : > { %v4226_v17 = vsel %vm4222_vm2, %v4188_v2, 0.0  ;;  %v4302_v60 = vmul.f32 %v7538_v51, %v4188_v2  ;;  %v7553_v18 = vadd.f32 %v3775_v56, %v1625_v46  ;;  %v7561_v46 = vpop.permute.xlu0 %4098 }
 0x1ed   : > { %v4227_v21 = vadd.f32 %v4226_v17, %v4225_v4  ;;  %v4191_v24 = vmul.f32 %v7549_v14, %v4034_v44  ;;  %v4341_v32 = vsel %vm4222_vm2, %v4303_v52, 0.0 }
 0x1ee   : > { %v4339_v11 = vsel %vm4222_vm2, %v4302_v60, 0.0  ;;  %v4190_v28 = vmul.f32 %v7553_v18, %v4029_v39  ;;  %v5969_v31 = vpop.f32.mrb[6].mxu0  ;;  %v7571_v39 = vpop.permute.xlu1 %4103 }
 0x1ef   : > { %v4340_v35 = vadd.f32 %v4339_v11, %v4338_v1  ;;  %v4305_v36 = vmul.f32 %v7549_v14, %v4191_v24  ;;  %v4229_v40 = vadd.f32 %v4228_v25, %v4227_v21  ;;  %v3785_v22 = vpop.f32.mrb[7].mxu0  ;;  %v7566_v33 = vadd.f32 %v5969_v31, %v7482_v55 }
 0x1f0   : > { %v4230_v26 = vsel %vm4222_vm2, %v4190_v28, 0.0  ;;  %v4304_v44 = vmul.f32 %v7553_v18, %v4190_v28  ;;  %v7569_v34 = vadd.f32 %v3785_v22, %v7484_v59  ;;  %v4232_v42 = vsel %vm4222_vm2, %v4191_v24, 0.0  ;;  %v7591_v60 = vpop.permute.xlu0 %4108 }
 0x1f1   : > { %v4231_v37 = vadd.f32 %v4230_v26, %v4229_v40  ;;  %v4342_v38 = vadd.f32 %v4341_v32, %v4340_v35  ;;  %v4193_v45 = vmul.f32 %v7566_v33, %v7488_v48  ;;  %v4345_v2 = vsel %vm4222_vm2, %v4305_v36, 0.0 }
 0x1f2   : > { %v4343_v43 = vsel %vm4222_vm2, %v4304_v44, 0.0  ;;  %v4192_v49 = vmul.f32 %v7569_v34, %v7486_v47  ;;  %v5972_v53 = vpop.f32.mrb[8].mxu0  ;;  %v7594_v21 = vpop.permute.xlu1 %4113 }
 0x1f3   : > { %v4344_v55 = vadd.f32 %v4343_v43, %v4342_v38  ;;  %v4233_v61 = vadd.f32 %v4232_v42, %v4231_v37  ;;  %v7580_v59 = vadd.f32 %v5972_v53, %v7490_v54  ;;  %v3795_v63 = vpop.f32.mrb[9].mxu0  ;;  %v4307_v6 = vmul.f32 %v7566_v33, %v4193_v45 }
 0x1f4   : > { %v4234_v4 = vsel %vm4222_vm2, %v4192_v49, 0.0  ;;  %v4306_v52 = vmul.f32 %v7569_v34, %v4192_v49  ;;  %v7589_v17 = vadd.f32 %v3795_v63, %v7492_v58  ;;  %v4236_v24 = vsel %vm4222_vm2, %v4193_v45, 0.0  ;;  %v7618_v43 = vpop.permute.xlu0 %4118 }
 0x1f5   : > { %v4235_v56 = vadd.f32 %v4234_v4, %v4233_v61  ;;  %v4346_v48 = vadd.f32 %v4345_v2, %v4344_v55  ;;  %v4195_v47 = vmul.f32 %v7580_v59, %v7498_v3  ;;  %v4349_v25 = vsel %vm4222_vm2, %v4307_v6, 0.0 }
 0x1f6   : > { %v4347_v54 = vsel %vm4222_vm2, %v4306_v52, 0.0  ;;  %v5975_v1 = vpop.f32.mrb[10].mxu0  ;;  %v4194_v28 = vmul.f32 %v7589_v17, %v7494_v62  ;;  %v7622_v55 = vpop.permute.xlu1 %4123 }
 0x1f7   : > { %v4348_v11 = vadd.f32 %v4347_v54, %v4346_v48  ;;  %v3805_v31 = vpop.f32.mrb[11].mxu0  ;;  %v4309_v3 = vmul.f32 %v7580_v59, %v4195_v47  ;;  %v4237_v58 = vadd.f32 %v4236_v24, %v4235_v56  ;;  %v7602_v32 = vadd.f32 %v5975_v1, %v7496_v0 }
 0x1f8   : > { %v7605_v35 = vadd.f32 %v3805_v31, %v7500_v5  ;;  %v4238_v36 = vsel %vm4222_vm2, %v4194_v28, 0.0  ;;  %v4308_v40 = vmul.f32 %v7589_v17, %v4194_v28  ;;  %v4240_v38 = vsel %vm4222_vm2, %v4195_v47, 0.0  ;;  %v7645_v31 = vpop.permute.xlu0 %4128 }
 0x1f9   : > { %v4350_v22 = vadd.f32 %v4349_v25, %v4348_v11  ;;  %v4239_v26 = vadd.f32 %v4238_v36, %v4237_v58  ;;  %v4197_v44 = vmul.f32 %v7602_v32, %v7508_v10  ;;  %v4353_v45 = vsel %vm4222_vm2, %v4309_v3, 0.0 }
 0x1fa   : > { %v4196_v62 = vmul.f32 %v7605_v35, %v7506_v9  ;;  %v5978_v37 = vpop.f32.mrb[12].mxu0  ;;  %v4351_v0 = vsel %vm4222_vm2, %v4308_v40, 0.0  ;;  %v7651_v40 = vpop.permute.xlu1 %4133 }
 0x1fb   : > { %v7616_v5 = vadd.f32 %v5978_v37, %v7502_v7  ;;  %v3815_v42 = vpop.f32.mrb[13].mxu0  ;;  %v4352_v49 = vadd.f32 %v4351_v0, %v4350_v22  ;;  %v4311_v53 = vmul.f32 %v7602_v32, %v4197_v44  ;;  %v4241_v10 = vadd.f32 %v4240_v38, %v4239_v26 }
 0x1fc   : > { %v4242_v9 = vsel %vm4222_vm2, %v4196_v62, 0.0  ;;  %v4310_v61 = vmul.f32 %v7605_v35, %v4196_v62  ;;  %v7629_v7 = vadd.f32 %v3815_v42, %v7504_v8  ;;  %v4244_v52 = vsel %vm4222_vm2, %v4197_v44, 0.0 }
 0x1fd   : > { %v4199_v63 = vmul.f32 %v7616_v5, %v7518_v19  ;;  %v4243_v2 = vadd.f32 %v4242_v9, %v4241_v10  ;;  %v4354_v6 = vadd.f32 %v4353_v45, %v4352_v49  ;;  %v4357_v25 = vsel %vm4222_vm2, %v4311_v53, 0.0 }
 0x1fe   : > { %v5981_v4 = vpop.f32.mrb[14].mxu0  ;;  %v4355_v56 = vsel %vm4222_vm2, %v4310_v61, 0.0  ;;  %v4198_v47 = vmul.f32 %v7629_v7, %v7514_v15 }
 0x1ff   : > { %v4313_v48 = vmul.f32 %v7616_v5, %v4199_v63  ;;  %v3825_v54 = vpop.f32.mrb[15].mxu0  ;;  %v4356_v1 = vadd.f32 %v4355_v56, %v4354_v6  ;;  %v4245_v24 = vadd.f32 %v4244_v52, %v4243_v2  ;;  %v7637_v19 = vadd.f32 %v5981_v4, %v7510_v12 }
 0x200   : > { %v7640_v8 = vadd.f32 %v3825_v54, %v7512_v13  ;;  %v4246_v11 = vsel %vm4222_vm2, %v4198_v47, 0.0  ;;  %v4312_v28 = vmul.f32 %v7629_v7, %v4198_v47  ;;  %v4248_v13 = vsel %vm4222_vm2, %v4199_v63, 0.0  ;;  %v7678_v47 = vpop.permute.xlu1 %4143 }
 0x201   : > { %v4247_v3 = vadd.f32 %v4246_v11, %v4245_v24  ;;  %v4358_v58 = vadd.f32 %v4357_v25, %v4356_v1  ;;  %v4201_v15 = vmul.f32 %v7637_v19, %v7528_v30  ;;  %v4361_v62 = vsel %vm4222_vm2, %v4313_v48, 0.0  ;;  %v7676_v48 = vpop.permute.xlu0 %4138 }
 0x202   : > { %v4200_v12 = vmul.f32 %v7640_v8, %v7524_v27  ;;  %v5984_v36 = vpop.f32.mrb[16].mxu0  ;;  %v4359_v22 = vsel %vm4222_vm2, %v4312_v28, 0.0 }
 0x203   : > { %v7656_v26 = vadd.f32 %v5984_v36, %v7516_v16  ;;  %v3835_v44 = vpop.f32.mrb[17].mxu0  ;;  %v4360_v37 = vadd.f32 %v4359_v22, %v4358_v58  ;;  %v4315_v38 = vmul.f32 %v7637_v19, %v4201_v15  ;;  %v4249_v30 = vadd.f32 %v4248_v13, %v4247_v3 }
 0x204   : > { %v4250_v0 = vsel %vm4222_vm2, %v4200_v12, 0.0  ;;  %v4314_v27 = vmul.f32 %v7640_v8, %v4200_v12  ;;  %v7665_v45 = vadd.f32 %v3835_v44, %v7520_v20  ;;  %v4252_v9 = vsel %vm4222_vm2, %v4201_v15, 0.0 }
 0x205   : > { %v4203_v42 = vmul.f32 %v7656_v26, %v7546_v50  ;;  %v4251_v49 = vadd.f32 %v4250_v0, %v4249_v30  ;;  %v4362_v16 = vadd.f32 %v4361_v62, %v4360_v37  ;;  %v4365_v54 = vsel %vm4222_vm2, %v4315_v38, 0.0 }
 0x206   : > { %v5763_v53 = vpop.f32.mrb[18].mxu1  ;;  %v5987_v10 = vpop.f32.mrb[18].mxu0  ;;  %v4363_v61 = vsel %vm4222_vm2, %v4314_v27, 0.0  ;;  %v4202_v2 = vmul.f32 %v7665_v45, %v7541_v57 }
 0x207   : > { %v4317_v63 = vmul.f32 %v7656_v26, %v4203_v42  ;;  %v2125_v6 = vpop.f32.mrb[19].mxu1  ;;  %v3845_v4 = vpop.f32.mrb[19].mxu0  ;;  %v4364_v52 = vadd.f32 %v4363_v61, %v4362_v16  ;;  %v4253_v50 = vadd.f32 %v4252_v9, %v4251_v49  ;;  %v7672_v56 = vadd.f32 %v5987_v10, %v5763_v53 }
 0x208   : > { %v7674_v20 = vadd.f32 %v3845_v4, %v2125_v6  ;;  %v4254_v1 = vsel %vm4222_vm2, %v4202_v2, 0.0  ;;  %v4316_v24 = vmul.f32 %v7665_v45, %v4202_v2  ;;  %v4256_v15 = vsel %vm4222_vm2, %v4203_v42, 0.0 }
 0x209   : > { %v4255_v25 = vadd.f32 %v4254_v1, %v4253_v50  ;;  %v4366_v57 = vadd.f32 %v4365_v54, %v4364_v52  ;;  %v4205_v11 = vmul.f32 %v7672_v56, %v7571_v39  ;;  %v4369_v44 = vsel %vm4222_vm2, %v4317_v63, 0.0  ;;  %v7708_v50 = vpop.permute.xlu0 %4148  ;;  %v4154_v54 = vpop.permute.xlu1 %4153 }
 0x20a   : > { %v4204_v28 = vmul.f32 %v7674_v20, %v7561_v46  ;;  %v5766_v3 = vpop.f32.mrb[20].mxu1  ;;  %v5990_v58 = vpop.f32.mrb[20].mxu0  ;;  %v4367_v12 = vsel %vm4222_vm2, %v4316_v24, 0.0 }
 0x20b   : > { %v7689_v36 = vadd.f32 %v5990_v58, %v5766_v3  ;;  %v2135_v13 = vpop.f32.mrb[21].mxu1  ;;  %v3855_v22 = vpop.f32.mrb[21].mxu0  ;;  %v4368_v62 = vadd.f32 %v4367_v12, %v4366_v57  ;;  %v4319_v37 = vmul.f32 %v7672_v56, %v4205_v11  ;;  %v4257_v38 = vadd.f32 %v4256_v15, %v4255_v25 }
 0x20c   : > { %v4258_v39 = vsel %vm4222_vm2, %v4204_v28, 0.0  ;;  %v4318_v46 = vmul.f32 %v7674_v20, %v4204_v28  ;;  %v7697_v0 = vadd.f32 %v3855_v22, %v2135_v13  ;;  %v4260_v53 = vsel %vm4222_vm2, %v4205_v11, 0.0 }
 0x20d   : > { %v4207_v30 = vmul.f32 %v7689_v36, %v7594_v21  ;;  %v4259_v27 = vadd.f32 %v4258_v39, %v4257_v38  ;;  %v4370_v42 = vadd.f32 %v4369_v44, %v4368_v62  ;;  %v4373_v1 = vsel %vm4222_vm2, %v4319_v37, 0.0 }
 0x20e   : > { %v5769_v49 = vpop.f32.mrb[22].mxu1  ;;  %v5993_v16 = vpop.f32.mrb[22].mxu0  ;;  %v4371_v10 = vsel %vm4222_vm2, %v4318_v46, 0.0  ;;  %v4206_v61 = vmul.f32 %v7697_v0, %v7591_v60 }
 0x20f   : > { %v4321_v9 = vmul.f32 %v7689_v36, %v4207_v30  ;;  %v2145_v63 = vpop.f32.mrb[23].mxu1  ;;  %v3865_v2 = vpop.f32.mrb[23].mxu0  ;;  %v4372_v6 = vadd.f32 %v4371_v10, %v4370_v42  ;;  %v4261_v4 = vadd.f32 %v4260_v53, %v4259_v27  ;;  %v7704_v21 = vadd.f32 %v5993_v16, %v5769_v49 }
 0x210   : > { %v7706_v52 = vadd.f32 %v3865_v2, %v2145_v63  ;;  %v4262_v24 = vsel %vm4222_vm2, %v4206_v61, 0.0  ;;  %v4320_v25 = vmul.f32 %v7697_v0, %v4206_v61  ;;  %v4264_v15 = vsel %vm4222_vm2, %v4207_v30, 0.0 }
 0x211   : > { %v4263_v57 = vadd.f32 %v4262_v24, %v4261_v4  ;;  %v4374_v11 = vadd.f32 %v4373_v1, %v4372_v6  ;;  %v4209_v60 = vmul.f32 %v7704_v21, %v7622_v55  ;;  %v4377_v62 = vsel %vm4222_vm2, %v4321_v9, 0.0  ;;  %v4159_v24 = vpop.permute.xlu0 %4158 }
 0x212   : > { %v4208_v28 = vmul.f32 %v7706_v52, %v7618_v43  ;;  %v5772_v3 = vpop.f32.mrb[24].mxu1  ;;  %v5996_v58 = vpop.f32.mrb[24].mxu0  ;;  %v4375_v12 = vsel %vm4222_vm2, %v4320_v25, 0.0 }
 0x213   : > { %v7719_v13 = vadd.f32 %v5996_v58, %v5772_v3  ;;  %v2155_v22 = vpop.f32.mrb[25].mxu1  ;;  %v3875_v44 = vpop.f32.mrb[25].mxu0  ;;  %v4376_v37 = vadd.f32 %v4375_v12, %v4374_v11  ;;  %v4323_v38 = vmul.f32 %v7704_v21, %v4209_v60  ;;  %v4265_v39 = vadd.f32 %v4264_v15, %v4263_v57 }
 0x214   : > { %v4266_v55 = vsel %vm4222_vm2, %v4208_v28, 0.0  ;;  %v4322_v43 = vmul.f32 %v7706_v52, %v4208_v28  ;;  %v7727_v30 = vadd.f32 %v3875_v44, %v2155_v22  ;;  %v4268_v53 = vsel %vm4222_vm2, %v4209_v60, 0.0  ;;  %v4164_v25 = vpop.permute.xlu1 %4163 }
 0x215   : > { %v4211_v46 = vmul.f32 %v7719_v13, %v7651_v40  ;;  %v4267_v27 = vadd.f32 %v4266_v55, %v4265_v39  ;;  %v4378_v42 = vadd.f32 %v4377_v62, %v4376_v37  ;;  %v4381_v57 = vsel %vm4222_vm2, %v4323_v38, 0.0 }
 0x216   : > { %v5775_v49 = vpop.f32.mrb[26].mxu1  ;;  %v5999_v16 = vpop.f32.mrb[26].mxu0  ;;  %v4379_v10 = vsel %vm4222_vm2, %v4322_v43, 0.0  ;;  %v4210_v61 = vmul.f32 %v7727_v30, %v7645_v31 }
 0x217   : > { %v4325_v9 = vmul.f32 %v7719_v13, %v4211_v46  ;;  %v2165_v63 = vpop.f32.mrb[27].mxu1  ;;  %v3885_v2 = vpop.f32.mrb[27].mxu0  ;;  %v4380_v6 = vadd.f32 %v4379_v10, %v4378_v42  ;;  %v4269_v4 = vadd.f32 %v4268_v53, %v4267_v27  ;;  %v7734_v40 = vadd.f32 %v5999_v16, %v5775_v49 }
 0x218   : > { %v7736_v1 = vadd.f32 %v3885_v2, %v2165_v63  ;;  %v4270_v11 = vsel %vm4222_vm2, %v4210_v61, 0.0  ;;  %v4324_v60 = vmul.f32 %v7727_v30, %v4210_v61  ;;  %v4272_v22 = vsel %vm4222_vm2, %v4211_v46, 0.0 }
 0x219   : > { %v4271_v28 = vadd.f32 %v4270_v11, %v4269_v4  ;;  %v4382_v3 = vadd.f32 %v4381_v57, %v4380_v6  ;;  %v4213_v31 = vmul.f32 %v7734_v40, %v7678_v47  ;;  %v4385_v39 = vsel %vm4222_vm2, %v4325_v9, 0.0 }
 0x21a   : > { %v4212_v58 = vmul.f32 %v7736_v1, %v7676_v48  ;;  %v5778_v15 = vpop.f32.mrb[28].mxu1  ;;  %v6002_v12 = vpop.f32.mrb[28].mxu0  ;;  %v4383_v44 = vsel %vm4222_vm2, %v4324_v60, 0.0 }
 0x21b   : > { %v7747_v62 = vadd.f32 %v6002_v12, %v5778_v15  ;;  %v2175_v37 = vpop.f32.mrb[29].mxu1  ;;  %v3895_v38 = vpop.f32.mrb[29].mxu0  ;;  %v4384_v55 = vadd.f32 %v4383_v44, %v4382_v3  ;;  %v4327_v43 = vmul.f32 %v7734_v40, %v4213_v31  ;;  %v4273_v27 = vadd.f32 %v4272_v22, %v4271_v28 }
 0x21c   : > { %v4274_v47 = vsel %vm4222_vm2, %v4212_v58, 0.0  ;;  %v4326_v48 = vmul.f32 %v7736_v1, %v4212_v58  ;;  %v7754_v49 = vadd.f32 %v3895_v38, %v2175_v37  ;;  %v4276_v61 = vsel %vm4222_vm2, %v4213_v31, 0.0  ;;  %v4169_v28 = vpop.permute.xlu0 %4168  ;;  %v4174_v3 = vpop.permute.xlu1 %4173 }
 0x21d   : > { %v4215_v42 = vmul.f32 %v7747_v62, %v4154_v54  ;;  %v4275_v46 = vadd.f32 %v4274_v47, %v4273_v27  ;;  %v4386_v16 = vadd.f32 %v4385_v39, %v4384_v55  ;;  %v4389_v58 = vsel %vm4222_vm2, %v4327_v43, 0.0 }
 0x21e   : > { %v5781_v53 = vpop.f32.mrb[30].mxu1  ;;  %v6005_v10 = vpop.f32.mrb[30].mxu0  ;;  %v4387_v9 = vsel %vm4222_vm2, %v4326_v48, 0.0  ;;  %v4214_v2 = vmul.f32 %v7754_v49, %v7708_v50 }
 0x21f   : > { %v4329_v63 = vmul.f32 %v7747_v62, %v4215_v42  ;;  %v2185_v6 = vpop.f32.mrb[31].mxu1  ;;  %v3905_v4 = vpop.f32.mrb[31].mxu0  ;;  %v4388_v57 = vadd.f32 %v4387_v9, %v4386_v16  ;;  %v4277_v11 = vadd.f32 %v4276_v61, %v4275_v46  ;;  %v7761_v54 = vadd.f32 %v6005_v10, %v5781_v53 }
 0x220   : > { %v7763_v60 = vadd.f32 %v3905_v4, %v2185_v6  ;;  %v4278_v31 = vsel %vm4222_vm2, %v4214_v2, 0.0  ;;  %v4328_v15 = vmul.f32 %v7754_v49, %v4214_v2  ;;  %v4280_v39 = vsel %vm4222_vm2, %v4215_v42, 0.0 }
 0x221   : > { %v4279_v12 = vadd.f32 %v4278_v31, %v4277_v11  ;;  %v4390_v22 = vadd.f32 %v4389_v58, %v4388_v57  ;;  %v4217_v50 = vmul.f32 %v7761_v54, %v4164_v25  ;;  %v4393_v48 = vsel %vm4222_vm2, %v4329_v63, 0.0 }
 0x222   : > { %v4216_v44 = vmul.f32 %v7763_v60, %v4159_v24  ;;  %v5784_v37 = vpop.f32.mrb[32].mxu1  ;;  %v6008_v38 = vpop.f32.mrb[32].mxu0  ;;  %v4391_v55 = vsel %vm4222_vm2, %v4328_v15, 0.0 }
 0x223   : > { %v7772_v27 = vadd.f32 %v6008_v38, %v5784_v37  ;;  %v2195_v47 = vpop.f32.mrb[33].mxu1  ;;  %v3915_v43 = vpop.f32.mrb[33].mxu0  ;;  %v4392_v46 = vadd.f32 %v4391_v55, %v4390_v22  ;;  %v4331_v16 = vmul.f32 %v7761_v54, %v4217_v50  ;;  %v4281_v53 = vadd.f32 %v4280_v39, %v4279_v12 }
 0x224   : > { %v4282_v25 = vsel %vm4222_vm2, %v4216_v44, 0.0  ;;  %v4330_v24 = vmul.f32 %v7763_v60, %v4216_v44  ;;  %v7779_v61 = vadd.f32 %v3915_v43, %v2195_v47  ;;  %v4284_v4 = vsel %vm4222_vm2, %v4217_v50, 0.0  ;;  %v4184_v44 = vpop.permute.xlu1 %4183 }
 0x225   : > { %v4219_v10 = vmul.f32 %v7772_v27, %v4174_v3  ;;  %v4283_v42 = vadd.f32 %v4282_v25, %v4281_v53  ;;  %v4394_v9 = vadd.f32 %v4393_v48, %v4392_v46  ;;  %v4179_v3 = vpop.permute.xlu0 %4178  ;;  %v4397_v37 = vsel %vm4222_vm2, %v4331_v16, 0.0 }
 0x226   : > { %v5787_v2 = vpop.f32.mrb[34].mxu1  ;;  %v6011_v6 = vpop.f32.mrb[34].mxu0  ;;  %v4395_v63 = vsel %vm4222_vm2, %v4330_v24, 0.0  ;;  %v4218_v57 = vmul.f32 %v7779_v61, %v4169_v28 }
 0x227   : > { %v2205_v11 = vpop.f32.mrb[35].mxu1  ;;  %v3925_v58 = vpop.f32.mrb[35].mxu0  ;;  %v4396_v31 = vadd.f32 %v4395_v63, %v4394_v9  ;;  %v4285_v15 = vadd.f32 %v4284_v4, %v4283_v42  ;;  %v7784_v12 = vadd.f32 %v6011_v6, %v5787_v2  ;;  %v4333_v38 = vmul.f32 %v7772_v27, %v4219_v10 }
 0x228   : > { %v7786_v22 = vadd.f32 %v3925_v58, %v2205_v11  ;;  %v4286_v50 = vsel %vm4222_vm2, %v4218_v57, 0.0  ;;  %v4332_v39 = vmul.f32 %v7779_v61, %v4218_v57  ;;  %v4288_v48 = vsel %vm4222_vm2, %v4219_v10, 0.0 }
 0x229   : > { %v4287_v55 = vadd.f32 %v4286_v50, %v4285_v15  ;;  %v4398_v28 = vadd.f32 %v4397_v37, %v4396_v31  ;;  %v4221_v47 = vmul.f32 %v7784_v12, %v4184_v44  ;;  %v4401_v16 = vsel %vm4222_vm2, %v4333_v38, 0.0 }
 0x22a   : > { %v4220_v43 = vmul.f32 %v7786_v22, %v4179_v3  ;;  %v4399_v46 = vsel %vm4222_vm2, %v4332_v39, 0.0 }
 0x22b   : > { %v4400_v53 = vadd.f32 %v4399_v46, %v4398_v28  ;;  %v4289_v25 = vadd.f32 %v4288_v48, %v4287_v55  ;;  %v4335_v24 = vmul.f32 %v7784_v12, %v4221_v47  ;;  %v4292_v4 = vsel %vm4222_vm2, %v4221_v47, 0.0 }
 0x22c   : > { %v4290_v42 = vsel %vm4222_vm2, %v4220_v43, 0.0  ;;  %v4334_v9 = vmul.f32 %v7786_v22, %v4220_v43 }
 0x22d   : > { %v4291_v2 = vadd.f32 %v4290_v42, %v4289_v25  ;;  %v4402_v6 = vadd.f32 %v4401_v16, %v4400_v53  ;;  %v4405_v11 = vsel %vm4222_vm2, %v4335_v24, 0.0 }
 0x22e   : > { %v4403_v63 = vsel %vm4222_vm2, %v4334_v9, 0.0 }
 0x22f   : > { %v4293_v57 = vadd.f32 %v4292_v4, %v4291_v2  ;;  %v4404_v10 = vadd.f32 %v4403_v63, %v4402_v6 }
 0x231   : > { %v4294_v58 = vrot.slane %v4293_v57, 4  ;;  %v4406_v31 = vadd.f32 %v4405_v11, %v4404_v10 }
 0x233   : > { %v4407_v15 = vrot.slane %v4406_v31, 4  ;;  %v4295_v3 = vadd.f32 %v4294_v58, %v4293_v57 }
 0x235   : > { %v4296_v44 = vrot.slane %v4295_v3, 2  ;;  %v4408_v37 = vadd.f32 %v4407_v15, %v4406_v31 }
 0x237   : > { %v4297_v38 = vadd.f32 %v4296_v44, %v4295_v3  ;;  %v4409_v50 = vrot.slane %v4408_v37, 2 }
 0x239   : > { %v4298_v39 = vrot.slane %v4297_v38, 1  ;;  %v4410_v55 = vadd.f32 %v4409_v50, %v4408_v37  ;;  %v4474_v37 = vlaneseq }
 0x23b   : > { %v4299_v28 = vadd.f32 %v4298_v39, %v4297_v38  ;;  %v4411_v43 = vrot.slane %v4410_v55, 1  ;;  %v4475_v38 = vshrl.u32 %v4474_v37, 7 }
 0x23d   : > { %4418 = vrot.lane.b32.xlu1 %v4299_v28, %s6405_s25  ;;  %4414 = vrot.lane.b32.xlu0 %v4299_v28, %s6406_s11  ;;  %v4412_v47 = vadd.f32 %v4411_v43, %v4410_v55  ;;  %v4476_v43 = vsub.s32 0, %v4475_v38 }
 0x241   : > { %4422 = vrot.lane.b32.xlu1 %v4299_v28, %s6407_s14  ;;  %4427 = vrot.lane.b32.xlu0 %v4412_v47, %s6406_s11 }
 0x245   : > { %4435 = vrot.lane.b32.xlu1 %v4412_v47, %s6407_s14  ;;  %4431 = vrot.lane.b32.xlu0 %v4412_v47, %s6405_s25 }
 0x2af   : > { %v4419_v48 = vpop.permute.xlu1 %4418  ;;  %v4415_v46 = vpop.permute.xlu0 %4414 }
 0x2b0   : > { %v4417_v53 = vadd.f32 %v4415_v46, %v4299_v28 }
 0x2b2   : > { %v4421_v25 = vadd.f32 %v4419_v48, %v4417_v53 }
 0x2b3   : > { %v4423_v16 = vpop.permute.xlu1 %4422  ;;  %v4428_v24 = vpop.permute.xlu0 %4427 }
 0x2b4   : > { %v4425_v42 = vadd.f32 %v4423_v16, %v4421_v25  ;;  %v4430_v2 = vadd.f32 %v4428_v24, %v4412_v47 }
 0x2b6   : > { %v4439_v9 = vmul.f32 0.0009765625, %v4425_v42 }
 0x2b7   : > { %v4432_v6 = vpop.permute.xlu0 %4431  ;;  %v4436_v63 = vpop.permute.xlu1 %4435 }
 0x2b8   : > { %v4434_v4 = vadd.f32 %v4432_v6, %v4430_v2  ;;  %4450 = vrot.lane.b32.xlu1 %v4439_v9, %s6408_s15  ;;  %4447 = vrot.lane.b32.xlu0 %v4439_v9, %s6409_s16  ;;  %v4441_v10 = vmul.f32 %v4439_v9, %v4439_v9 }
 0x2ba   : > { %v4438_v57 = vadd.f32 %v4436_v63, %v4434_v4 }
 0x2bc   : > { %v4440_v11 = vmul.f32 0.0009765625, %v4438_v57  ;;  %4453 = vrot.lane.b32.xlu0 %v4439_v9, %s6410_s17 }
 0x2be   : > { %v4442_v58 = vsub.f32 %v4440_v11, %v4441_v10 }
 0x2c0   : > { %v4443_v31 = vmax.f32 %v4442_v58, 0.0 }
 0x2c2   : > { %v4444_v15 = vadd.f32 1e-05, %v4443_v31 }
 0x2c4   : > { %6321 = vrsqrt.f32 %v4444_v15 }
 0x2ce   : > { %v6322_v3 = vpop.eup %6321 }
 0x2cf   : > { %4465 = vrot.lane.b32.xlu0 %v6322_v3, %s6408_s15  ;;  %4462 = vrot.lane.b32.xlu1 %v6322_v3, %s6409_s16 }
 0x2d3   : > { %4468 = vrot.lane.b32.xlu1 %v6322_v3, %s6410_s17 }
 0x32a   : > { %v4448_v44 = vpop.permute.xlu0 %4447  ;;  %v4451_v50 = vpop.permute.xlu1 %4450 }
 0x32b   : > { %v4457_v39 = vsel %vm4456_vm3, %v4439_v9, %v4448_v44 }
 0x32c   : > { %v4458_v28 = vsel %vm246_vm1, %v4457_v39, %v4451_v50 }
 0x32e   : > { %v4454_v55 = vpop.permute.xlu0 %4453 }
 0x32f   : > { %v4460_v47 = vsel %vm4459_vm4, %v4458_v28, %v4454_v55 }
 0x330   : > { %v7805_v46 = vrot.slane %v4460_v47, %v4476_v43 }
 0x332   : > { %v4478_v24 = vsub.f32 %v7526_v29, %v7805_v46  ;;  %v4479_v42 = vsub.f32 %v7522_v23, %v7805_v46  ;;  %v4480_v9 = vsub.f32 %v7538_v51, %v7805_v46  ;;  %v4481_v2 = vsub.f32 %v7533_v41, %v7805_v46 }
 0x333   : > { %v4482_v6 = vsub.f32 %v7553_v18, %v7805_v46  ;;  %v4483_v4 = vsub.f32 %v7549_v14, %v7805_v46  ;;  %v4484_v63 = vsub.f32 %v7569_v34, %v7805_v46  ;;  %v4485_v23 = vsub.f32 %v7566_v33, %v7805_v46 }
 0x334   : > { %v4486_v51 = vsub.f32 %v7589_v17, %v7805_v46  ;;  %v4487_v41 = vsub.f32 %v7580_v59, %v7805_v46  ;;  %v4488_v18 = vsub.f32 %v7605_v35, %v7805_v46  ;;  %v4489_v14 = vsub.f32 %v7602_v32, %v7805_v46 }
 0x335   : > { %v4490_v34 = vsub.f32 %v7629_v7, %v7805_v46  ;;  %v4491_v33 = vsub.f32 %v7616_v5, %v7805_v46  ;;  %v4492_v17 = vsub.f32 %v7640_v8, %v7805_v46  ;;  %v4493_v59 = vsub.f32 %v7637_v19, %v7805_v46 }
 0x336   : > { %v4494_v10 = vsub.f32 %v7665_v45, %v7805_v46  ;;  %v4495_v35 = vsub.f32 %v7656_v26, %v7805_v46  ;;  %v4496_v32 = vsub.f32 %v7674_v20, %v7805_v46  ;;  %v4497_v7 = vsub.f32 %v7672_v56, %v7805_v46 }
 0x337   : > { %v4498_v5 = vsub.f32 %v7697_v0, %v7805_v46  ;;  %v4499_v8 = vsub.f32 %v7689_v36, %v7805_v46  ;;  %v4500_v19 = vsub.f32 %v7706_v52, %v7805_v46  ;;  %v4501_v45 = vsub.f32 %v7704_v21, %v7805_v46 }
 0x338   : > { %v4502_v26 = vsub.f32 %v7727_v30, %v7805_v46  ;;  %v4503_v20 = vsub.f32 %v7719_v13, %v7805_v46  ;;  %v4504_v56 = vsub.f32 %v7736_v1, %v7805_v46  ;;  %v4505_v0 = vsub.f32 %v7734_v40, %v7805_v46 }
 0x339   : > { %v4506_v36 = vsub.f32 %v7754_v49, %v7805_v46  ;;  %v4507_v52 = vsub.f32 %v7747_v62, %v7805_v46  ;;  %v4508_v21 = vsub.f32 %v7763_v60, %v7805_v46  ;;  %v4509_v30 = vsub.f32 %v7761_v54, %v7805_v46 }
 0x33a   : > { %v4510_v13 = vsub.f32 %v7779_v61, %v7805_v46  ;;  %v4511_v1 = vsub.f32 %v7772_v27, %v7805_v46  ;;  %v4512_v40 = vsub.f32 %v7786_v22, %v7805_v46  ;;  %v4513_v49 = vsub.f32 %v7784_v12, %v7805_v46 }
 0x341   : > { %v4463_v48 = vpop.permute.xlu1 %4462  ;;  %v4466_v25 = vpop.permute.xlu0 %4465 }
 0x342   : > { %v4471_v53 = vsel %vm4456_vm3, %v6322_v3, %v4463_v48 }
 0x343   : > { %v4472_v29 = vsel %vm246_vm1, %v4471_v53, %v4466_v25 }
 0x345   : > { %v4469_v16 = vpop.permute.xlu1 %4468 }
 0x346   : > { %v4473_v57 = vsel %vm4459_vm4, %v4472_v29, %v4469_v16 }
 0x347   : > { %v4517_v11 = vrot.slane %v4473_v57, %v4476_v43 }
 0x349   : > { %v4518_v58 = vmul.f32 %v4517_v11, %v4478_v24  ;;  %v4519_v62 = vmul.f32 %v4517_v11, %v4479_v42  ;;  %v4520_v31 = vmul.f32 %v4517_v11, %v4480_v9  ;;  %v4521_v15 = vmul.f32 %v4517_v11, %v4481_v2 }
 0x34a   : > { %v4522_v60 = vmul.f32 %v4517_v11, %v4482_v6  ;;  %v4523_v3 = vmul.f32 %v4517_v11, %v4483_v4  ;;  %v4524_v44 = vmul.f32 %v4517_v11, %v4484_v63  ;;  %v4525_v54 = vmul.f32 %v4517_v11, %v4485_v23 }
 0x34b   : > { %v4526_v37 = vmul.f32 %v4517_v11, %v4486_v51  ;;  %v4527_v38 = vmul.f32 %v4517_v11, %v4487_v41  ;;  %v4528_v61 = vmul.f32 %v4517_v11, %v4488_v18  ;;  %v4529_v50 = vmul.f32 %v4517_v11, %v4489_v14 }
 0x34c   : > { %v4530_v39 = vmul.f32 %v4517_v11, %v4490_v34  ;;  %v4531_v27 = vmul.f32 %v4517_v11, %v4491_v33  ;;  %v7881_v55 = vmul.f32 %v4517_v11, %v4492_v17  ;;  %v7883_v22 = vmul.f32 %v4517_v11, %v4493_v59 }
 0x34d   : > { %v7885_v28 = vmul.f32 %v4517_v11, %v4494_v10  ;;  %v7887_v12 = vmul.f32 %v4517_v11, %v4495_v35  ;;  %v7889_v43 = vmul.f32 %v4517_v11, %v4496_v32  ;;  %v7891_v47 = vmul.f32 %v4517_v11, %v4497_v7 }
 0x34e   : > { %v7893_v48 = vmul.f32 %v4517_v11, %v4498_v5  ;;  %v7895_v46 = vmul.f32 %v4517_v11, %v4499_v8  ;;  %v7897_v53 = vmul.f32 %v4517_v11, %v4500_v19  ;;  %v7899_v25 = vmul.f32 %v4517_v11, %v4501_v45 }
 0x34f   : > { %v7901_v16 = vmul.f32 %v4517_v11, %v4502_v26  ;;  %v7903_v24 = vmul.f32 %v4517_v11, %v4503_v20  ;;  %v7905_v42 = vmul.f32 %v4517_v11, %v4504_v56  ;;  %v7907_v9 = vmul.f32 %v4517_v11, %v4505_v0 }
 0x350   : > { %v7909_v2 = vmul.f32 %v4517_v11, %v4506_v36  ;;  %v7911_v6 = vmul.f32 %v4517_v11, %v4507_v52  ;;  %v4590_v4 = vmul.f32 0.70710677, %v4518_v58  ;;  %v4591_v63 = vmul.f32 0.70710677, %v4519_v62 }
 0x351   : > { %v4592_v29 = vmul.f32 0.70710677, %v4520_v31  ;;  %v7913_v23 = vmul.f32 %v4517_v11, %v4508_v21  ;;  %v7915_v51 = vmul.f32 %v4517_v11, %v4509_v30  ;;  %v7917_v41 = vmul.f32 %v4517_v11, %v4510_v13 }
 0x352   : > { %v4593_v57 = vmul.f32 0.70710677, %v4521_v15  ;;  %v7919_v18 = vmul.f32 %v4517_v11, %v4511_v1  ;;  %v7921_v14 = vmul.f32 %v4517_v11, %v4512_v40  ;;  %v4594_v34 = vmul.f32 0.70710677, %v4522_v60 }
 0x353   : > { %6323 = verf.f32 %v4590_v4  ;;  %v7923_v33 = vmul.f32 %v4517_v11, %v4513_v49  ;;  %v4554_v17 = vmul.f32 0.5, %v4518_v58  ;;  %v4595_v59 = vmul.f32 0.70710677, %v4523_v3 }
 0x354   : > { %6325 = verf.f32 %v4591_v63  ;;  %v4555_v10 = vmul.f32 0.5, %v4519_v62  ;;  %v4556_v35 = vmul.f32 0.5, %v4520_v31  ;;  %v4596_v32 = vmul.f32 0.70710677, %v4524_v44 }
 0x355   : > { %6327 = verf.f32 %v4592_v29  ;;  %v7925_v7 = vmul.f32 0.5, %v4521_v15  ;;  %v7927_v5 = vmul.f32 0.5, %v4522_v60  ;;  %v4597_v8 = vmul.f32 0.70710677, %v4525_v54 }
 0x356   : > { %6329 = verf.f32 %v4593_v57  ;;  %v7929_v19 = vmul.f32 0.5, %v4523_v3  ;;  %v7931_v45 = vmul.f32 0.5, %v4524_v44  ;;  %v4598_v11 = vmul.f32 0.70710677, %v4526_v37 }
 0x357   : > { %6331 = verf.f32 %v4594_v34  ;;  %v7933_v26 = vmul.f32 0.5, %v4525_v54  ;;  %v7935_v20 = vmul.f32 0.5, %v4526_v37  ;;  %v4599_v56 = vmul.f32 0.70710677, %v4527_v38 }
 0x358   : > { %6333 = verf.f32 %v4595_v59  ;;  %v7937_v0 = vmul.f32 0.5, %v4527_v38  ;;  %v7939_v36 = vmul.f32 0.5, %v4528_v61  ;;  %v4600_v52 = vmul.f32 0.70710677, %v4528_v61 }
 0x359   : > { %6335 = verf.f32 %v4596_v32  ;;  %v7941_v21 = vmul.f32 0.5, %v4529_v50  ;;  %v7943_v30 = vmul.f32 0.5, %v4530_v39  ;;  %v4601_v13 = vmul.f32 0.70710677, %v4529_v50 }
 0x35a   : > { %6337 = verf.f32 %v4597_v8  ;;  %v7946_v1 = vmul.f32 0.5, %v4531_v27  ;;  %v7949_v40 = vmul.f32 0.5, %v7881_v55  ;;  %v4602_v49 = vmul.f32 0.70710677, %v4530_v39 }
 0x35b   : > { %6339 = verf.f32 %v4598_v11  ;;  %v7952_v58 = vmul.f32 0.5, %v7883_v22  ;;  %v7955_v62 = vmul.f32 0.5, %v7885_v28  ;;  %v4603_v31 = vmul.f32 0.70710677, %v4531_v27 }
 0x35c   : > { %6341 = verf.f32 %v4599_v56  ;;  %v7958_v60 = vmul.f32 0.5, %v7887_v12  ;;  %v7961_v3 = vmul.f32 0.5, %v7889_v43  ;;  %v4604_v44 = vmul.f32 0.70710677, %v7881_v55 }
 0x35d   : > { %v6324_v15 = vpop.eup %6323  ;;  %6343 = verf.f32 %v4600_v52  ;;  %v7965_v37 = vmul.f32 0.5, %v7891_v47  ;;  %v4605_v38 = vmul.f32 0.70710677, %v7883_v22  ;;  %v7974_v39 = vmul.f32 0.5, %v7893_v48 }
 0x35e   : > { %v6326_v54 = vpop.eup %6325  ;;  %6345 = verf.f32 %v4601_v13  ;;  %v4662_v61 = vadd.f32 1.0, %v6324_v15  ;;  %v4606_v27 = vmul.f32 0.70710677, %v7885_v28  ;;  %v4607_v63 = vmul.f32 0.70710677, %v7887_v12 }
 0x35f   : > { %v6328_v50 = vpop.eup %6327  ;;  %6347 = verf.f32 %v4602_v49  ;;  %v4663_v55 = vadd.f32 1.0, %v6326_v54  ;;  %v4608_v34 = vmul.f32 0.70710677, %v7889_v43  ;;  %v4609_v11 = vmul.f32 0.70710677, %v7891_v47 }
 0x360   : > { %v6330_v4 = vpop.eup %6329  ;;  %6349 = verf.f32 %v4603_v31  ;;  %v4664_v22 = vadd.f32 1.0, %v6328_v50  ;;  %v4698_v29 = vmul.f32 %v4662_v61, %v4554_v17  ;;  %v4610_v52 = vmul.f32 0.70710677, %v7893_v48 }
 0x361   : > { %v6332_v57 = vpop.eup %6331  ;;  %6351 = verf.f32 %v4604_v44  ;;  %v4665_v59 = vadd.f32 1.0, %v6330_v4  ;;  %v4699_v32 = vmul.f32 %v4663_v55, %v4555_v10  ;;  %v4611_v13 = vmul.f32 0.70710677, %v7895_v46 }
 0x362   : > { %v6334_v8 = vpop.eup %6333  ;;  %6353 = verf.f32 %v4605_v38  ;;  %v4666_v28 = vadd.f32 1.0, %v6332_v57  ;;  %v4700_v56 = vmul.f32 %v4664_v22, %v4556_v35  ;;  %4734 = vst.msk [vmem:[%s7971_s20] sm:$0xff] %vm4222_vm2, %v4698_v29  ;;  %v4612_v48 = vmul.f32 0.70710677, %v7897_v53 }
 0x363   : > { %v6336_v12 = vpop.eup %6335  ;;  %6355 = verf.f32 %v4606_v27  ;;  %v4667_v17 = vadd.f32 1.0, %v6334_v8  ;;  %v4701_v43 = vmul.f32 %v4665_v59, %v7925_v7  ;;  %4735 = vst.msk [vmem:[%s7971_s20 + $0x8] sm:$0xff] %vm4222_vm2, %v4699_v32  ;;  %v4613_v44 = vmul.f32 0.70710677, %v7899_v25 }
 0x364   : > { %v6338_v10 = vpop.eup %6337  ;;  %6357 = verf.f32 %v4607_v63  ;;  %v4668_v47 = vadd.f32 1.0, %v6336_v12  ;;  %v4702_v35 = vmul.f32 %v4666_v28, %v7927_v5  ;;  %4736 = vst.msk [vmem:[%s7971_s20 + $0x10] sm:$0xff] %vm4222_vm2, %v4700_v56  ;;  %v4614_v61 = vmul.f32 0.70710677, %v7901_v16 }
 0x365   : > { %v6340_v49 = vpop.eup %6339  ;;  %6359 = verf.f32 %v4608_v34  ;;  %v4669_v31 = vadd.f32 1.0, %v6338_v10  ;;  %v4703_v7 = vmul.f32 %v4667_v17, %v7929_v19  ;;  %4737 = vst.msk [vmem:[%s7971_s20 + $0x18] sm:$0xff] %vm4222_vm2, %v4701_v43  ;;  %v4615_v55 = vmul.f32 0.70710677, %v7903_v24 }
 0x366   : > { %v6342_v15 = vpop.eup %6341  ;;  %6361 = verf.f32 %v4609_v11  ;;  %v4670_v54 = vadd.f32 1.0, %v6340_v49  ;;  %v4704_v5 = vmul.f32 %v4668_v47, %v7931_v45  ;;  %4738 = vst.msk [vmem:[%s7971_s20 + $0x20] sm:$0xff] %vm4222_vm2, %v4702_v35  ;;  %v4616_v22 = vmul.f32 0.70710677, %v7905_v42 }
 0x367   : > { %v6344_v38 = vpop.eup %6343  ;;  %6363 = verf.f32 %v4610_v52  ;;  %v4671_v50 = vadd.f32 1.0, %v6342_v15  ;;  %v4705_v19 = vmul.f32 %v4669_v31, %v7933_v26  ;;  %4739 = vst.msk [vmem:[%s7971_s20 + $0x28] sm:$0xff] %vm4222_vm2, %v4703_v7  ;;  %v4617_v34 = vmul.f32 0.70710677, %v7907_v9 }
 0x368   : > { %v6346_v27 = vpop.eup %6345  ;;  %6365 = verf.f32 %v4611_v13  ;;  %v4672_v4 = vadd.f32 1.0, %v6344_v38  ;;  %v4706_v45 = vmul.f32 %v4670_v54, %v7935_v20  ;;  %4740 = vst.msk [vmem:[%s7971_s20 + $0x30] sm:$0xff] %vm4222_vm2, %v4704_v5  ;;  %v4618_v8 = vmul.f32 0.70710677, %v7909_v2 }
 0x369   : > { %v6348_v63 = vpop.eup %6347  ;;  %6367 = verf.f32 %v4612_v48  ;;  %v4673_v29 = vadd.f32 1.0, %v6346_v27  ;;  %v4707_v26 = vmul.f32 %v4671_v50, %v7937_v0  ;;  %4741 = vst.msk [vmem:[%s7971_s20 + $0x38] sm:$0xff] %vm4222_vm2, %v4705_v19  ;;  %v4619_v56 = vmul.f32 0.70710677, %v7911_v6 }
 0x36a   : > { %v6350_v57 = vpop.eup %6349  ;;  %6369 = verf.f32 %v4613_v44  ;;  %v4674_v59 = vadd.f32 1.0, %v6348_v63  ;;  %v4708_v20 = vmul.f32 %v4672_v4, %v7939_v36  ;;  %4742 = vst.msk [vmem:[%s7971_s20 + $0x40] sm:$0xff] %vm4222_vm2, %v4706_v45  ;;  %v4620_v17 = vmul.f32 0.70710677, %v7913_v23 }
 0x36b   : > { %v6352_v32 = vpop.eup %6351  ;;  %6371 = verf.f32 %v4614_v61  ;;  %v4675_v11 = vadd.f32 1.0, %v6350_v57  ;;  %v4709_v0 = vmul.f32 %v4673_v29, %v7941_v21  ;;  %4743 = vst.msk [vmem:[%s7971_s20 + $0x48] sm:$0xff] %vm4222_vm2, %v4707_v26  ;;  %v4621_v13 = vmul.f32 0.70710677, %v7915_v51 }
 0x36c   : > { %v6354_v28 = vpop.eup %6353  ;;  %6373 = verf.f32 %v4615_v55  ;;  %v4676_v12 = vadd.f32 1.0, %v6352_v32  ;;  %v4710_v36 = vmul.f32 %v4674_v59, %v7943_v30  ;;  %4744 = vst.msk [vmem:[%s7971_s20 + $0x50] sm:$0xff] %vm4222_vm2, %v4708_v20  ;;  %v4622_v49 = vmul.f32 0.70710677, %v7917_v41 }
 0x36d   : > { %v6356_v52 = vpop.eup %6355  ;;  %6375 = verf.f32 %v4616_v22  ;;  %v4677_v43 = vadd.f32 1.0, %v6354_v28  ;;  %v4711_v21 = vmul.f32 %v4675_v11, %v7946_v1  ;;  %4745 = vst.msk [vmem:[%s7971_s20 + $0x58] sm:$0xff] %vm4222_vm2, %v4709_v0  ;;  %v4623_v7 = vmul.f32 0.70710677, %v7919_v18 }
 0x36e   : > { %v6358_v10 = vpop.eup %6357  ;;  %6377 = verf.f32 %v4617_v34  ;;  %v4678_v47 = vadd.f32 1.0, %v6356_v52  ;;  %v4712_v30 = vmul.f32 %v4676_v12, %v7949_v40  ;;  %4746 = vst.msk [vmem:[%s7971_s20 + $0x60] sm:$0xff] %vm4222_vm2, %v4710_v36  ;;  %v4624_v54 = vmul.f32 0.70710677, %v7921_v14 }
 0x36f   : > { %v6360_v35 = vpop.eup %6359  ;;  %6379 = verf.f32 %v4618_v8  ;;  %v4679_v48 = vadd.f32 1.0, %v6358_v10  ;;  %v4713_v1 = vmul.f32 %v4677_v43, %v7952_v58  ;;  %4747 = vst.msk [vmem:[%s7971_s20 + $0x68] sm:$0xff] %vm4222_vm2, %v4711_v21  ;;  %v4625_v61 = vmul.f32 0.70710677, %v7923_v33 }
 0x370   : > { %v6362_v31 = vpop.eup %6361  ;;  %6381 = verf.f32 %v4619_v56  ;;  %v4680_v15 = vadd.f32 1.0, %v6360_v35  ;;  %v4714_v40 = vmul.f32 %v4678_v47, %v7955_v62  ;;  %4748 = vst.msk [vmem:[%s7971_s20 + $0x70] sm:$0xff] %vm4222_vm2, %v4712_v30  ;;  %v4575_v27 = vmul.f32 0.5, %v7895_v46 }
 0x371   : > { %v6364_v44 = vpop.eup %6363  ;;  %6383 = verf.f32 %v4620_v17  ;;  %v4681_v5 = vadd.f32 1.0, %v6362_v31  ;;  %v4715_v58 = vmul.f32 %v4679_v48, %v7958_v60  ;;  %4749 = vst.msk [vmem:[%s7971_s20 + $0x78] sm:$0xff] %vm4222_vm2, %v4713_v1  ;;  %v4576_v45 = vmul.f32 0.5, %v7897_v53 }
 0x372   : > { %v6366_v38 = vpop.eup %6365  ;;  %6385 = verf.f32 %v4621_v13  ;;  %v4682_v50 = vadd.f32 1.0, %v6364_v44  ;;  %v4716_v62 = vmul.f32 %v4680_v15, %v7961_v3  ;;  %4750 = vst.msk [vmem:[%s7971_s20 + $0x80] sm:$0xff] %vm4222_vm2, %v4714_v40  ;;  %v4577_v46 = vmul.f32 0.5, %v7899_v25 }
 0x373   : > { %v6368_v19 = vpop.eup %6367  ;;  %6387 = verf.f32 %v4622_v49  ;;  %v4683_v55 = vadd.f32 1.0, %v6366_v38  ;;  %v4717_v60 = vmul.f32 %v4681_v5, %v7965_v37  ;;  %4751 = vst.msk [vmem:[%s7971_s20 + $0x88] sm:$0xff] %vm4222_vm2, %v4715_v58  ;;  %v4578_v53 = vmul.f32 0.5, %v7901_v16 }
 0x374   : > { %v6370_v4 = vpop.eup %6369  ;;  %6389 = verf.f32 %v4623_v7  ;;  %v4684_v63 = vadd.f32 1.0, %v6368_v19  ;;  %v4718_v3 = vmul.f32 %v4682_v50, %v7974_v39  ;;  %4752 = vst.msk [vmem:[%s7971_s20 + $0x90] sm:$0xff] %vm4222_vm2, %v4716_v62  ;;  %v4579_v59 = vmul.f32 0.5, %v7903_v24 }
 0x375   : > { %v6372_v22 = vpop.eup %6371  ;;  %6391 = verf.f32 %v4624_v54  ;;  %v4685_v29 = vadd.f32 1.0, %v6370_v4  ;;  %v4719_v26 = vmul.f32 %v4683_v55, %v4575_v27  ;;  %4753 = vst.msk [vmem:[%s7971_s20 + $0x98] sm:$0xff] %vm4222_vm2, %v4717_v60  ;;  %v4580_v8 = vmul.f32 0.5, %v7905_v42 }
 0x376   : > { %v6374_v37 = vpop.eup %6373  ;;  %6393 = verf.f32 %v4625_v61  ;;  %v4686_v57 = vadd.f32 1.0, %v6372_v22  ;;  %v4720_v34 = vmul.f32 %v4684_v63, %v4576_v45  ;;  %4754 = vst.msk [vmem:[%s7971_s20 + $0xa0] sm:$0xff] %vm4222_vm2, %v4718_v3  ;;  %v4581_v28 = vmul.f32 0.5, %v7907_v9 }
 0x377   : > { %v6376_v39 = vpop.eup %6375  ;;  %v4687_v20 = vadd.f32 1.0, %v6374_v37  ;;  %v4721_v25 = vmul.f32 %v4685_v29, %v4577_v46  ;;  %4755 = vst.msk [vmem:[%s7971_s20 + $0xa8] sm:$0xff] %vm4222_vm2, %v4719_v26  ;;  %v4582_v36 = vmul.f32 0.5, %v7909_v2  ;;  %v4583_v43 = vmul.f32 0.5, %v7911_v6 }
 0x378   : > { %v6378_v32 = vpop.eup %6377  ;;  %v4688_v11 = vadd.f32 1.0, %v6376_v39  ;;  %v4722_v0 = vmul.f32 %v4686_v57, %v4578_v53  ;;  %4756 = vst.msk [vmem:[%s7971_s20 + $0xb0] sm:$0xff] %vm4222_vm2, %v4720_v34  ;;  %v4584_v13 = vmul.f32 0.5, %v7913_v23  ;;  %v4585_v35 = vmul.f32 0.5, %v7915_v51 }
 0x379   : > { %v6380_v16 = vpop.eup %6379  ;;  %v4689_v56 = vadd.f32 1.0, %v6378_v32  ;;  %v4723_v12 = vmul.f32 %v4687_v20, %v4579_v59  ;;  %4757 = vst.msk [vmem:[%s7971_s20 + $0xb8] sm:$0xff] %vm4222_vm2, %v4721_v25  ;;  %v4586_v1 = vmul.f32 0.5, %v7917_v41  ;;  %v4587_v15 = vmul.f32 0.5, %v7919_v18 }
 0x37a   : > { %v6382_v24 = vpop.eup %6381  ;;  %v4690_v52 = vadd.f32 1.0, %v6380_v16  ;;  %v4724_v17 = vmul.f32 %v4688_v11, %v4580_v8  ;;  %4758 = vst.msk [vmem:[%s7971_s20 + $0xc0] sm:$0xff] %vm4222_vm2, %v4722_v0  ;;  %v4588_v54 = vmul.f32 0.5, %v7921_v14  ;;  %v4589_v58 = vmul.f32 0.5, %v7923_v33 }
 0x37b   : > { %v6384_v42 = vpop.eup %6383  ;;  %v4691_v21 = vadd.f32 1.0, %v6382_v24  ;;  %v4725_v10 = vmul.f32 %v4689_v56, %v4581_v28  ;;  %4759 = vst.msk [vmem:[%s7971_s20 + $0xc8] sm:$0xff] %vm4222_vm2, %v4723_v12 }
 0x37c   : > { %v6386_v9 = vpop.eup %6385  ;;  %v4692_v47 = vadd.f32 1.0, %v6384_v42  ;;  %v4726_v30 = vmul.f32 %v4690_v52, %v4582_v36  ;;  %4760 = vst.msk [vmem:[%s7971_s20 + $0xd0] sm:$0xff] %vm4222_vm2, %v4724_v17 }
 0x37d   : > { %v6388_v2 = vpop.eup %6387  ;;  %v4693_v49 = vadd.f32 1.0, %v6386_v9  ;;  %v4727_v48 = vmul.f32 %v4691_v21, %v4583_v43  ;;  %4761 = vst.msk [vmem:[%s7971_s20 + $0xd8] sm:$0xff] %vm4222_vm2, %v4725_v10 }
 0x37e   : > { %v6390_v6 = vpop.eup %6389  ;;  %v4694_v31 = vadd.f32 1.0, %v6388_v2  ;;  %v4728_v7 = vmul.f32 %v4692_v47, %v4584_v13  ;;  %4762 = vst.msk [vmem:[%s7971_s20 + $0xe0] sm:$0xff] %vm4222_vm2, %v4726_v30 }
 0x37f   : > { %v6392_v23 = vpop.eup %6391  ;;  %v4695_v40 = vadd.f32 1.0, %v6390_v6  ;;  %v4729_v51 = vmul.f32 %v4693_v49, %v4585_v35  ;;  %4763 = vst.msk [vmem:[%s7971_s20 + $0xe8] sm:$0xff] %vm4222_vm2, %v4727_v48 }
 0x380   : > { %v6394_v44 = vpop.eup %6393  ;;  %v4696_v41 = vadd.f32 1.0, %v6392_v23  ;;  %v4730_v5 = vmul.f32 %v4694_v31, %v4586_v1  ;;  %4764 = vst.msk [vmem:[%s7971_s20 + $0xf0] sm:$0xff] %vm4222_vm2, %v4728_v7 }
 0x381   : > { %v4697_v38 = vadd.f32 1.0, %v6394_v44  ;;  %v4731_v61 = vmul.f32 %v4695_v40, %v4587_v15  ;;  %4765 = vst.msk [vmem:[%s7971_s20 + $0xf8] sm:$0xff] %vm4222_vm2, %v4729_v51 }
 0x382   : > { %v4732_v18 = vmul.f32 %v4696_v41, %v4588_v54  ;;  %4766 = vst.msk [vmem:[%s7971_s20 + $0x100] sm:$0xff] %vm4222_vm2, %v4730_v5 }
 0x383   : > { %v4733_v50 = vmul.f32 %v4697_v38, %v4589_v58  ;;  %4767 = vst.msk [vmem:[%s7971_s20 + $0x108] sm:$0xff] %vm4222_vm2, %v4731_v61 }
 0x384   : > { %4768 = vst.msk [vmem:[%s7971_s20 + $0x110] sm:$0xff] %vm4222_vm2, %v4732_v18 }
 0x385   : > { %4769 = vst.msk [vmem:[%s7971_s20 + $0x118] sm:$0xff] %vm4222_vm2, %v4733_v50 }
 0x386 PF: > { %s13_s12 = sadd.s32 1, %s6402_s12  }
 0x387   : > { %p10_p4 = scmp.ge.s32.totalorder %s13_s12, 4  }
 0x389   :  { %12 = sbr.rel (!%p10_p4) target bundleno = 1 (0x1), region = 70 }

</bundles_post_ra>
